<compile_context>
chip_gen: v7x
topology: tpu7x:2x2x1
jax: 0.10.0
libtpu: 0.0.40
codegen_flags: <defaults>
</compile_context>

<pallas_src>
import math

import jax
import jax.numpy as jnp
import numpy as np
from jax.experimental import pallas as pl
from jax.experimental.pallas import tpu as pltpu


def _round_up(x, m):
    return ((x + m - 1) // m) * m


# ---------------------------------------------------------------------------
# Fused kernel: all layers + all timesteps + final 1x1 conv, one batch element
# per grid step.
# ---------------------------------------------------------------------------
def _make_fused_kernel(layer_cfg, H, W, PF, T):
    """layer_cfg: list of (Cx, Ch, K) per layer. PF = flat zero-pad width."""
    HW = H * W
    n_layers = len(layer_cfg)
    padmax = max(k // 2 for (_, _, k) in layer_cfg)

    def kernel(*refs):
        # ---- inputs -------------------------------------------------------
        x_ref = refs[0]                         # (1, T, Cx0, HW + 2*PF) f32
        mask_ref = refs[1]                      # (2*padmax+1, CMAX, HW) f32
        w_refs = refs[2:2 + n_layers]           # per layer (4*Ch, Kpad) bf16
        wf_ref = refs[2 + n_layers]             # (n_out, Ch_last) f32
        bf_ref = refs[3 + n_layers]             # (n_out, 1) f32
        out_ref = refs[4 + n_layers]            # (1, n_out, HW) f32
        scratch = refs[5 + n_layers:]
        hpad_refs = scratch[0::3]               # per layer (Ch, HW + 2*PF) f32
        c_refs = scratch[1::3]                  # per layer (Ch, HW) f32
        stage_refs = scratch[2::3]              # per layer (Kpad, HW) bf16

        # ---- per-batch-element init ----------------------------------------
        # The zero halo of hpad_* implements the conv's "same" padding, so only
        # the interior [PF, PF+HW) is ever overwritten below.  The staging
        # slab is zeroed once (padding rows stay zero; weight columns there are
        # zero too) and its constant-ones row folds the bias into the matmul.
        for li in range(n_layers):
            Cx, Ch, K = layer_cfg[li]
            Cin = Cx + Ch
            hpad_refs[li][...] = jnp.zeros(hpad_refs[li].shape, jnp.float32)
            c_refs[li][...] = jnp.zeros(c_refs[li].shape, jnp.float32)
            stage_refs[li][...] = jnp.zeros(stage_refs[li].shape, jnp.bfloat16)
            stage_refs[li][pl.ds(K * K * Cin, 1), :] = jnp.ones((1, HW),
                                                                jnp.bfloat16)

        # ---- sequential time loop, fully in-kernel --------------------------
        @pl.loop(0, T)
        def _step(t):
            for li in range(n_layers):
                Cx, Ch, K = layer_cfg[li]
                Cin = Cx + Ch
                pad = K // 2
                stage = stage_refs[li]

                def read_x(s, _li=li):          # shifted layer input (Cx, HW)
                    if _li == 0:
                        v = x_ref[0, pl.ds(t, 1), :, pl.ds(PF + s, HW)]
                        return v[0]
                    return hpad_refs[_li - 1][:, pl.ds(PF + s, HW)]

                def read_h(s, _li=li):          # shifted recurrent h (Ch, HW)
                    return hpad_refs[_li][:, pl.ds(PF + s, HW)]

                # im2col staging: rows ordered tap-major, [x chans ; h chans]
                # within each tap.  Rows out of range (dy) are covered by the
                # zero halo; column wrap (dx) is killed by the per-dx mask.
                for dx in range(-pad, pad + 1):
                    if dx != 0:
                        mrow = mask_ref[dx + padmax]      # (CMAX, HW)
                        mx = mrow[:Cx]
                        mh = mrow[:Ch]
                    for dy in range(-pad, pad + 1):
                        s = dy * W + dx
                        tap = (dy + pad) * K + (dx + pad)
                        xs = read_x(s)
                        hs = read_h(s)
                        if dx != 0:
                            xs = xs * mx
                            hs = hs * mh
                        stage[pl.ds(tap * Cin, Cx), :] = xs.astype(jnp.bfloat16)
                        stage[pl.ds(tap * Cin + Cx, Ch), :] = \
                            hs.astype(jnp.bfloat16)

                # Single MXU matmul per layer per timestep (bias folded in via
                # the constant-ones staging row / bias weight column).
                acc = jnp.dot(w_refs[li][...], stage[...],
                              preferred_element_type=jnp.float32)  # (4*Ch, HW)

                # Gate order matches torch.split: i, f, o, g (8-sublane slices).
                i_g = jax.nn.sigmoid(acc[0 * Ch:1 * Ch])
                f_g = jax.nn.sigmoid(acc[1 * Ch:2 * Ch])
                o_g = jax.nn.sigmoid(acc[2 * Ch:3 * Ch])
                g_g = jnp.tanh(acc[3 * Ch:4 * Ch])

                c_next = f_g * c_refs[li][...] + i_g * g_g
                h_next = o_g * jnp.tanh(c_next)

                c_refs[li][...] = c_next
                hpad_refs[li][:, pl.ds(PF, HW)] = h_next   # lane-aligned store

        # ---- final 1x1 conv on the last timestep's top-layer h --------------
        h_last = hpad_refs[-1][:, pl.ds(PF, HW)]           # (Ch_last, HW)
        y = jnp.dot(wf_ref[...], h_last, preferred_element_type=jnp.float32)
        out_ref[0] = (y + bf_ref[...]).astype(out_ref.dtype)

    return kernel


# ---------------------------------------------------------------------------
# Wrapper
# ---------------------------------------------------------------------------
def convlstm_michael_forward(params, x_btchw):
    """x: (B, T, C, H, W) f32 -> (B, 3, H, W)  (return_sequences=False)."""
    B, T, C, H, W = x_btchw.shape
    HW = H * W
    layer_cfg = params["layer_cfg"]                 # [(Cx, Ch, K), ...]
    n_layers = len(layer_cfg)
    padmax = max(k // 2 for (_, _, k) in layer_cfg)
    # Flat halo: must cover max |dy*W + dx| and be a 128-lane multiple so the
    # state store / center-tap reads are unmasked full-lane accesses.
    PF = _round_up(padmax * (W + 1), 128)
    Wflat = HW + 2 * PF
    n_out = params["wf"].shape[0]
    CMAX = max(max(cx, ch) for (cx, ch, _) in layer_cfg)

    for (_, ch, _) in layer_cfg:
        assert ch % 8 == 0, "hidden_dim must be a multiple of 8 (gate slices)"

    # Channels-first flattened spatial layout; pad ONCE, outside the time loop.
    x_pad = jnp.pad(x_btchw.reshape(B, T, C, HW),
                    ((0, 0), (0, 0), (0, 0), (PF, PF)))

    # Column-validity masks per dx offset (kill w-wraparound of flat shifts),
    # pre-replicated across sublanes so the kernel needs no broadcast.
    w_idx = np.arange(HW) % W
    mask_np = np.stack([
        np.broadcast_to(((w_idx + dx >= 0) & (w_idx + dx < W))
                        .astype(np.float32), (CMAX, HW))
        for dx in range(-padmax, padmax + 1)])
    masks = jnp.asarray(mask_np)                    # (2*padmax+1, CMAX, HW)

    kernel = _make_fused_kernel(layer_cfg, H, W, PF, T)

    in_specs = [
        pl.BlockSpec((1, T, C, Wflat), lambda b: (b, 0, 0, 0)),
        pl.BlockSpec(masks.shape, lambda b: (0, 0, 0)),
    ]
    inputs = [x_pad, masks]
    for li in range(n_layers):
        w = params["w_stacked"][li]                 # (4*Ch, Kpad) bf16
        in_specs.append(pl.BlockSpec(w.shape, lambda b: (0, 0)))
        inputs.append(w)
    in_specs += [pl.BlockSpec(params["wf"].shape, lambda b: (0, 0)),
                 pl.BlockSpec(params["bf"].shape, lambda b: (0, 0))]
    inputs += [params["wf"], params["bf"]]

    scratch_shapes = []
    for li, (cx, ch, k) in enumerate(layer_cfg):
        kpad = params["w_stacked"][li].shape[1]
        scratch_shapes.append(pltpu.VMEM((ch, Wflat), jnp.float32))   # h (pad)
        scratch_shapes.append(pltpu.VMEM((ch, HW), jnp.float32))      # c
        scratch_shapes.append(pltpu.VMEM((kpad, HW), jnp.bfloat16))   # im2col

    out = pl.pallas_call(
        kernel,
        out_shape=jax.ShapeDtypeStruct((B, n_out, HW), jnp.float32),
        grid_spec=pltpu.PrefetchScalarGridSpec(
            num_scalar_prefetch=0,
            grid=(B,),                              # batch-parallel only
            in_specs=in_specs,
            out_specs=pl.BlockSpec((1, n_out, HW), lambda b: (b, 0, 0)),
            scratch_shapes=scratch_shapes,
        ),
        compiler_params=pltpu.CompilerParams(
            dimension_semantics=("parallel",)),
    )(*inputs)
    return out.reshape(B, n_out, H, W)


# TODO(synk): return_sequences=True (1x1 conv applied to every timestep's h)
# is not implemented; the module default (return_sequences=False) is.


# ---------------------------------------------------------------------------
# Parameter init (PyTorch-Conv2d-like uniform init).  The raw OIHW weights are
# kept for the reference; the kernel gets an im2col-stacked bf16 matrix per
# layer with the bias folded in as an extra column, zero-padded to a multiple
# of 8 along the contraction dim.
# ---------------------------------------------------------------------------
def init_params(key, input_dim, hidden_dims, kernel_sizes, n_out=3):
    n_layers = len(hidden_dims)
    keys = jax.random.split(key, 2 * n_layers + 2)
    w_stacked, raw_cells, layer_cfg = [], [], []
    for i in range(n_layers):
        cx = input_dim if i == 0 else hidden_dims[i - 1]
        ch = hidden_dims[i]
        k = kernel_sizes[i]
        cin = cx + ch
        bound = 1.0 / math.sqrt(cin * k * k)
        w_full = jax.random.uniform(keys[2 * i], (4 * ch, cin, k, k),
                                    jnp.float32, -bound, bound)      # OIHW
        b_full = jax.random.uniform(keys[2 * i + 1], (4 * ch,),
                                    jnp.float32, -bound, bound)
        # im2col layout: columns ordered (ky, kx, c) with c = [x chans; h chans]
        w_mat = jnp.transpose(w_full, (0, 2, 3, 1)).reshape(4 * ch, k * k * cin)
        w_aug = jnp.concatenate([w_mat, b_full[:, None]], axis=1)    # + bias col
        kdim = k * k * cin + 1
        kpad = _round_up(kdim, 8)
        w_aug = jnp.pad(w_aug, ((0, 0), (0, kpad - kdim)))
        w_stacked.append(w_aug.astype(jnp.bfloat16))
        raw_cells.append((w_full, b_full))
        layer_cfg.append((cx, ch, k))
    cin = hidden_dims[-1]
    bound = 1.0 / math.sqrt(cin)
    wf_full = jax.random.uniform(keys[-2], (n_out, cin, 1, 1),
                                 jnp.float32, -bound, bound)
    bf_full = jax.random.uniform(keys[-1], (n_out,), jnp.float32, -bound, bound)
    params = {"w_stacked": w_stacked,
              "wf": wf_full.reshape(n_out, cin),
              "bf": bf_full.reshape(n_out, 1),
              "layer_cfg": layer_cfg}
    raw = {"cells": raw_cells, "final": (wf_full, bf_full)}
    return params, raw


# ---------------------------------------------------------------------------
# Pure-JAX reference (mirrors the PyTorch module exactly)
# ---------------------------------------------------------------------------
def reference_forward(raw, x, hidden_dims, kernel_sizes):
    B, T, C, H, W = x.shape
    n_layers = len(hidden_dims)
    hs = [jnp.zeros((B, hidden_dims[i], H, W), jnp.float32)
          for i in range(n_layers)]
    cs = [jnp.zeros((B, hidden_dims[i], H, W), jnp.float32)
          for i in range(n_layers)]
    xt = None
    for t in range(T):
        xt = x[:, t]
        for li in range(n_layers):
            w_full, b_full = raw["cells"][li]
            k = kernel_sizes[li]
            pad = k // 2
            ch = hidden_dims[li]
            comb = jnp.concatenate([xt, hs[li]], axis=1)
            conv = jax.lax.conv_general_dilated(
                comb, w_full, (1, 1), [(pad, pad), (pad, pad)],
                dimension_numbers=("NCHW", "OIHW", "NCHW"),
                precision=jax.lax.Precision.HIGHEST,
            ) + b_full[None, :, None, None]
            i_g = jax.nn.sigmoid(conv[:, 0 * ch:1 * ch])
            f_g = jax.nn.sigmoid(conv[:, 1 * ch:2 * ch])
            o_g = jax.nn.sigmoid(conv[:, 2 * ch:3 * ch])
            g_g = jnp.tanh(conv[:, 3 * ch:4 * ch])
            cs[li] = f_g * cs[li] + i_g * g_g
            hs[li] = o_g * jnp.tanh(cs[li])
            xt = hs[li]
    wf_full, bf_full = raw["final"]
    out = jax.lax.conv_general_dilated(
        xt, wf_full, (1, 1), [(0, 0), (0, 0)],
        dimension_numbers=("NCHW", "OIHW", "NCHW"),
        precision=jax.lax.Precision.HIGHEST,
    ) + bf_full[None, :, None, None]
    return out


if __name__ == "__main__":
    B, T, C, H, W = 2, 4, 4, 16, 16
    hidden_dims = [8, 8]
    kernel_sizes = [3, 3]

    key = jax.random.PRNGKey(0)
    k_params, k_x = jax.random.split(key)
    params, raw = init_params(k_params, C, hidden_dims, kernel_sizes)
    x = jax.random.normal(k_x, (B, T, C, H, W), jnp.float32)

    fwd = jax.jit(lambda xx: convlstm_michael_forward(params, xx))
    out = jax.block_until_ready(fwd(x))
    assert out.shape == (B, 3, H, W), out.shape

    ref = jax.block_until_ready(
        reference_forward(raw, x, hidden_dims, kernel_sizes))
    np.testing.assert_allclose(np.asarray(out), np.asarray(ref),
                               rtol=5e-2, atol=5e-2)

    print("KERNEL_OK")
</pallas_src>

<mosaic_0001>
module attributes {stable_mosaic.version = 11 : i64} {
  func.func @kernel(%arg0: i32, %arg1: memref<1x4x4x512xf32, #tpu.memory_space<vmem>>, %arg2: memref<3x8x256xf32, #tpu.memory_space<vmem>>, %arg3: memref<32x112xbf16, #tpu.memory_space<vmem>>, %arg4: memref<32x152xbf16, #tpu.memory_space<vmem>>, %arg5: memref<3x8xf32, #tpu.memory_space<vmem>>, %arg6: memref<3x1xf32, #tpu.memory_space<vmem>>, %arg7: memref<1x3x256xf32, #tpu.memory_space<vmem>>, %arg8: memref<8x512xf32, #tpu.memory_space<vmem>>, %arg9: memref<8x256xf32, #tpu.memory_space<vmem>>, %arg10: memref<112x256xbf16, #tpu.memory_space<vmem>>, %arg11: memref<8x512xf32, #tpu.memory_space<vmem>>, %arg12: memref<8x256xf32, #tpu.memory_space<vmem>>, %arg13: memref<152x256xbf16, #tpu.memory_space<vmem>>) attributes {dimension_semantics = [#tpu.dimension_semantics<parallel>], iteration_bounds = array<i64: 2>, scalar_prefetch = 0 : i64, scratch_operands = 6 : i64, tpu.core_type = #tpu.core_type<tc>, window_params = [{transform_indices = @transform_0, window_bounds = array<i64: 1, 4, 4, 512>}, {pipeline_mode = #tpu.pipeline_mode<synchronous>, transform_indices = @transform_1, window_bounds = array<i64: 3, 8, 256>}, {pipeline_mode = #tpu.pipeline_mode<synchronous>, transform_indices = @transform_2, window_bounds = array<i64: 32, 112>}, {pipeline_mode = #tpu.pipeline_mode<synchronous>, transform_indices = @transform_3, window_bounds = array<i64: 32, 152>}, {pipeline_mode = #tpu.pipeline_mode<synchronous>, transform_indices = @transform_4, window_bounds = array<i64: 3, 8>}, {pipeline_mode = #tpu.pipeline_mode<synchronous>, transform_indices = @transform_5, window_bounds = array<i64: 3, 1>}, {transform_indices = @transform_6, window_bounds = array<i64: 1, 3, 256>}]} {
    %cst = arith.constant 0.000000e+00 : f32
    %0 = vector.broadcast %cst : f32 to vector<8x512xf32>
    %c0 = arith.constant 0 : index
    %c0_0 = arith.constant 0 : index
    %1 = vector.load %arg8[%c0, %c0_0] : memref<8x512xf32, #tpu.memory_space<vmem>>, vector<8x512xf32>
    tpu.vector_store %arg8[%c0, %c0_0], %0 {strides = array<i32>} : memref<8x512xf32, #tpu.memory_space<vmem>>, vector<8x512xf32>,
    %cst_1 = arith.constant 0.000000e+00 : f32
    %2 = vector.broadcast %cst_1 : f32 to vector<8x256xf32>
    %c0_2 = arith.constant 0 : index
    %c0_3 = arith.constant 0 : index
    %3 = vector.load %arg9[%c0_2, %c0_3] : memref<8x256xf32, #tpu.memory_space<vmem>>, vector<8x256xf32>
    tpu.vector_store %arg9[%c0_2, %c0_3], %2 {strides = array<i32>} : memref<8x256xf32, #tpu.memory_space<vmem>>, vector<8x256xf32>,
    %cst_4 = arith.constant 0.000000e+00 : bf16
    %4 = vector.broadcast %cst_4 : bf16 to vector<112x256xbf16>
    %c0_5 = arith.constant 0 : index
    %c0_6 = arith.constant 0 : index
    %5 = vector.load %arg10[%c0_5, %c0_6] : memref<112x256xbf16, #tpu.memory_space<vmem>>, vector<112x256xbf16>
    tpu.vector_store %arg10[%c0_5, %c0_6], %4 {strides = array<i32>} : memref<112x256xbf16, #tpu.memory_space<vmem>>, vector<112x256xbf16>,
    %cst_7 = arith.constant 1.000000e+00 : bf16
    %6 = vector.broadcast %cst_7 : bf16 to vector<1x256xbf16>
    %c108 = arith.constant 108 : index
    %c0_8 = arith.constant 0 : index
    %7 = vector.load %arg10[%c108, %c0_8] : memref<112x256xbf16, #tpu.memory_space<vmem>>, vector<1x256xbf16>
    tpu.vector_store %arg10[%c108, %c0_8], %6 {strides = array<i32>} : memref<112x256xbf16, #tpu.memory_space<vmem>>, vector<1x256xbf16>,
    %cst_9 = arith.constant 0.000000e+00 : f32
    %8 = vector.broadcast %cst_9 : f32 to vector<8x512xf32>
    %c0_10 = arith.constant 0 : index
    %c0_11 = arith.constant 0 : index
    %9 = vector.load %arg11[%c0_10, %c0_11] : memref<8x512xf32, #tpu.memory_space<vmem>>, vector<8x512xf32>
    tpu.vector_store %arg11[%c0_10, %c0_11], %8 {strides = array<i32>} : memref<8x512xf32, #tpu.memory_space<vmem>>, vector<8x512xf32>,
    %cst_12 = arith.constant 0.000000e+00 : f32
    %10 = vector.broadcast %cst_12 : f32 to vector<8x256xf32>
    %c0_13 = arith.constant 0 : index
    %c0_14 = arith.constant 0 : index
    %11 = vector.load %arg12[%c0_13, %c0_14] : memref<8x256xf32, #tpu.memory_space<vmem>>, vector<8x256xf32>
    tpu.vector_store %arg12[%c0_13, %c0_14], %10 {strides = array<i32>} : memref<8x256xf32, #tpu.memory_space<vmem>>, vector<8x256xf32>,
    %cst_15 = arith.constant 0.000000e+00 : bf16
    %12 = vector.broadcast %cst_15 : bf16 to vector<152x256xbf16>
    %c0_16 = arith.constant 0 : index
    %c0_17 = arith.constant 0 : index
    %13 = vector.load %arg13[%c0_16, %c0_17] : memref<152x256xbf16, #tpu.memory_space<vmem>>, vector<152x256xbf16>
    tpu.vector_store %arg13[%c0_16, %c0_17], %12 {strides = array<i32>} : memref<152x256xbf16, #tpu.memory_space<vmem>>, vector<152x256xbf16>,
    %cst_18 = arith.constant 1.000000e+00 : bf16
    %14 = vector.broadcast %cst_18 : bf16 to vector<1x256xbf16>
    %c144 = arith.constant 144 : index
    %c0_19 = arith.constant 0 : index
    %15 = vector.load %arg13[%c144, %c0_19] : memref<152x256xbf16, #tpu.memory_space<vmem>>, vector<1x256xbf16>
    tpu.vector_store %arg13[%c144, %c0_19], %14 {strides = array<i32>} : memref<152x256xbf16, #tpu.memory_space<vmem>>, vector<1x256xbf16>,
    %c0_i32 = arith.constant 0 : i32
    %c4_i32 = arith.constant 4 : i32
    %16 = arith.addi %c0_i32, %c4_i32 : i32
    %c1_i32 = arith.constant 1 : i32
    scf.for %arg14 = %c0_i32 to %16 step %c1_i32  : i32 {
      %c1_i32_30 = arith.constant 1 : i32
      %26 = arith.muli %arg14, %c1_i32_30 : i32
      %c0_i32_31 = arith.constant 0 : i32
      %27 = arith.addi %c0_i32_31, %26 : i32
      %c0_32 = arith.constant 0 : index
      %c0_33 = arith.constant 0 : index
      %c0_34 = arith.constant 0 : index
      %28 = vector.load %arg2[%c0_32, %c0_33, %c0_34] : memref<3x8x256xf32, #tpu.memory_space<vmem>>, vector<1x8x256xf32>
      %29 = vector.shape_cast %28 : vector<1x8x256xf32> to vector<8x256xf32>
      %30 = vector.extract_strided_slice %29 {offsets = [0, 0], sizes = [4, 256], strides = [1, 1]} : vector<8x256xf32> to vector<4x256xf32>
      %c0_35 = arith.constant 0 : index
      %31 = arith.index_cast %27 : i32 to index
      %c0_36 = arith.constant 0 : index
      %c111 = arith.constant 111 : index
      %32 = vector.load %arg1[%c0_35, %31, %c0_36, %c111] : memref<1x4x4x512xf32, #tpu.memory_space<vmem>>, vector<1x1x4x256xf32>
      %33 = vector.shape_cast %32 : vector<1x1x4x256xf32> to vector<1x4x256xf32>
      %34 = vector.shape_cast %33 : vector<1x4x256xf32> to vector<4x256xf32>
      %c0_37 = arith.constant 0 : index
      %c111_38 = arith.constant 111 : index
      %35 = vector.load %arg8[%c0_37, %c111_38] : memref<8x512xf32, #tpu.memory_space<vmem>>, vector<8x256xf32>
      %36 = arith.mulf %34, %30 : vector<4x256xf32>
      %37 = arith.mulf %35, %29 : vector<8x256xf32>
      %38 = arith.truncf %36 : vector<4x256xf32> to vector<4x256xbf16>
      %c0_39 = arith.constant 0 : index
      %c0_40 = arith.constant 0 : index
      %39 = vector.load %arg10[%c0_39, %c0_40] : memref<112x256xbf16, #tpu.memory_space<vmem>>, vector<4x256xbf16>
      tpu.vector_store %arg10[%c0_39, %c0_40], %38 {strides = array<i32>} : memref<112x256xbf16, #tpu.memory_space<vmem>>, vector<4x256xbf16>,
      %40 = arith.truncf %37 : vector<8x256xf32> to vector<8x256xbf16>
      %c4 = arith.constant 4 : index
      %c0_41 = arith.constant 0 : index
      %41 = vector.load %arg10[%c4, %c0_41] : memref<112x256xbf16, #tpu.memory_space<vmem>>, vector<8x256xbf16>
      tpu.vector_store %arg10[%c4, %c0_41], %40 {strides = array<i32>} : memref<112x256xbf16, #tpu.memory_space<vmem>>, vector<8x256xbf16>,
      %c0_42 = arith.constant 0 : index
      %42 = arith.index_cast %27 : i32 to index
      %c0_43 = arith.constant 0 : index
      %c127 = arith.constant 127 : index
      %43 = vector.load %arg1[%c0_42, %42, %c0_43, %c127] : memref<1x4x4x512xf32, #tpu.memory_space<vmem>>, vector<1x1x4x256xf32>
      %44 = vector.shape_cast %43 : vector<1x1x4x256xf32> to vector<1x4x256xf32>
      %45 = vector.shape_cast %44 : vector<1x4x256xf32> to vector<4x256xf32>
      %c0_44 = arith.constant 0 : index
      %c127_45 = arith.constant 127 : index
      %46 = vector.load %arg8[%c0_44, %c127_45] : memref<8x512xf32, #tpu.memory_space<vmem>>, vector<8x256xf32>
      %47 = arith.mulf %45, %30 : vector<4x256xf32>
      %48 = arith.mulf %46, %29 : vector<8x256xf32>
      %49 = arith.truncf %47 : vector<4x256xf32> to vector<4x256xbf16>
      %c36 = arith.constant 36 : index
      %c0_46 = arith.constant 0 : index
      %50 = vector.load %arg10[%c36, %c0_46] : memref<112x256xbf16, #tpu.memory_space<vmem>>, vector<4x256xbf16>
      tpu.vector_store %arg10[%c36, %c0_46], %49 {strides = array<i32>} : memref<112x256xbf16, #tpu.memory_space<vmem>>, vector<4x256xbf16>,
      %51 = arith.truncf %48 : vector<8x256xf32> to vector<8x256xbf16>
      %c40 = arith.constant 40 : index
      %c0_47 = arith.constant 0 : index
      %52 = vector.load %arg10[%c40, %c0_47] : memref<112x256xbf16, #tpu.memory_space<vmem>>, vector<8x256xbf16>
      tpu.vector_store %arg10[%c40, %c0_47], %51 {strides = array<i32>} : memref<112x256xbf16, #tpu.memory_space<vmem>>, vector<8x256xbf16>,
      %c0_48 = arith.constant 0 : index
      %53 = arith.index_cast %27 : i32 to index
      %c0_49 = arith.constant 0 : index
      %c143 = arith.constant 143 : index
      %54 = vector.load %arg1[%c0_48, %53, %c0_49, %c143] : memref<1x4x4x512xf32, #tpu.memory_space<vmem>>, vector<1x1x4x256xf32>
      %55 = vector.shape_cast %54 : vector<1x1x4x256xf32> to vector<1x4x256xf32>
      %56 = vector.shape_cast %55 : vector<1x4x256xf32> to vector<4x256xf32>
      %c0_50 = arith.constant 0 : index
      %c143_51 = arith.constant 143 : index
      %57 = vector.load %arg8[%c0_50, %c143_51] : memref<8x512xf32, #tpu.memory_space<vmem>>, vector<8x256xf32>
      %58 = arith.mulf %56, %30 : vector<4x256xf32>
      %59 = arith.mulf %57, %29 : vector<8x256xf32>
      %60 = arith.truncf %58 : vector<4x256xf32> to vector<4x256xbf16>
      %c72 = arith.constant 72 : index
      %c0_52 = arith.constant 0 : index
      %61 = vector.load %arg10[%c72, %c0_52] : memref<112x256xbf16, #tpu.memory_space<vmem>>, vector<4x256xbf16>
      tpu.vector_store %arg10[%c72, %c0_52], %60 {strides = array<i32>} : memref<112x256xbf16, #tpu.memory_space<vmem>>, vector<4x256xbf16>,
      %62 = arith.truncf %59 : vector<8x256xf32> to vector<8x256xbf16>
      %c76 = arith.constant 76 : index
      %c0_53 = arith.constant 0 : index
      %63 = vector.load %arg10[%c76, %c0_53] : memref<112x256xbf16, #tpu.memory_space<vmem>>, vector<8x256xbf16>
      tpu.vector_store %arg10[%c76, %c0_53], %62 {strides = array<i32>} : memref<112x256xbf16, #tpu.memory_space<vmem>>, vector<8x256xbf16>,
      %c0_54 = arith.constant 0 : index
      %64 = arith.index_cast %27 : i32 to index
      %c0_55 = arith.constant 0 : index
      %c112 = arith.constant 112 : index
      %65 = vector.load %arg1[%c0_54, %64, %c0_55, %c112] : memref<1x4x4x512xf32, #tpu.memory_space<vmem>>, vector<1x1x4x256xf32>
      %66 = vector.shape_cast %65 : vector<1x1x4x256xf32> to vector<1x4x256xf32>
      %67 = vector.shape_cast %66 : vector<1x4x256xf32> to vector<4x256xf32>
      %c0_56 = arith.constant 0 : index
      %c112_57 = arith.constant 112 : index
      %68 = vector.load %arg8[%c0_56, %c112_57] : memref<8x512xf32, #tpu.memory_space<vmem>>, vector<8x256xf32>
      %69 = arith.truncf %67 : vector<4x256xf32> to vector<4x256xbf16>
      %c12 = arith.constant 12 : index
      %c0_58 = arith.constant 0 : index
      %70 = vector.load %arg10[%c12, %c0_58] : memref<112x256xbf16, #tpu.memory_space<vmem>>, vector<4x256xbf16>
      tpu.vector_store %arg10[%c12, %c0_58], %69 {strides = array<i32>} : memref<112x256xbf16, #tpu.memory_space<vmem>>, vector<4x256xbf16>,
      %71 = arith.truncf %68 : vector<8x256xf32> to vector<8x256xbf16>
      %c16 = arith.constant 16 : index
      %c0_59 = arith.constant 0 : index
      %72 = vector.load %arg10[%c16, %c0_59] : memref<112x256xbf16, #tpu.memory_space<vmem>>, vector<8x256xbf16>
      tpu.vector_store %arg10[%c16, %c0_59], %71 {strides = array<i32>} : memref<112x256xbf16, #tpu.memory_space<vmem>>, vector<8x256xbf16>,
      %c0_60 = arith.constant 0 : index
      %73 = arith.index_cast %27 : i32 to index
      %c0_61 = arith.constant 0 : index
      %c128_62 = arith.constant 128 : index
      %74 = vector.load %arg1[%c0_60, %73, %c0_61, %c128_62] : memref<1x4x4x512xf32, #tpu.memory_space<vmem>>, vector<1x1x4x256xf32>
      %75 = vector.shape_cast %74 : vector<1x1x4x256xf32> to vector<1x4x256xf32>
      %76 = vector.shape_cast %75 : vector<1x4x256xf32> to vector<4x256xf32>
      %c0_63 = arith.constant 0 : index
      %c128_64 = arith.constant 128 : index
      %77 = vector.load %arg8[%c0_63, %c128_64] : memref<8x512xf32, #tpu.memory_space<vmem>>, vector<8x256xf32>
      %78 = arith.truncf %76 : vector<4x256xf32> to vector<4x256xbf16>
      %c48 = arith.constant 48 : index
      %c0_65 = arith.constant 0 : index
      %79 = vector.load %arg10[%c48, %c0_65] : memref<112x256xbf16, #tpu.memory_space<vmem>>, vector<4x256xbf16>
      tpu.vector_store %arg10[%c48, %c0_65], %78 {strides = array<i32>} : memref<112x256xbf16, #tpu.memory_space<vmem>>, vector<4x256xbf16>,
      %80 = arith.truncf %77 : vector<8x256xf32> to vector<8x256xbf16>
      %c52 = arith.constant 52 : index
      %c0_66 = arith.constant 0 : index
      %81 = vector.load %arg10[%c52, %c0_66] : memref<112x256xbf16, #tpu.memory_space<vmem>>, vector<8x256xbf16>
      tpu.vector_store %arg10[%c52, %c0_66], %80 {strides = array<i32>} : memref<112x256xbf16, #tpu.memory_space<vmem>>, vector<8x256xbf16>,
      %c0_67 = arith.constant 0 : index
      %82 = arith.index_cast %27 : i32 to index
      %c0_68 = arith.constant 0 : index
      %c144_69 = arith.constant 144 : index
      %83 = vector.load %arg1[%c0_67, %82, %c0_68, %c144_69] : memref<1x4x4x512xf32, #tpu.memory_space<vmem>>, vector<1x1x4x256xf32>
      %84 = vector.shape_cast %83 : vector<1x1x4x256xf32> to vector<1x4x256xf32>
      %85 = vector.shape_cast %84 : vector<1x4x256xf32> to vector<4x256xf32>
      %c0_70 = arith.constant 0 : index
      %c144_71 = arith.constant 144 : index
      %86 = vector.load %arg8[%c0_70, %c144_71] : memref<8x512xf32, #tpu.memory_space<vmem>>, vector<8x256xf32>
      %87 = arith.truncf %85 : vector<4x256xf32> to vector<4x256xbf16>
      %c84 = arith.constant 84 : index
      %c0_72 = arith.constant 0 : index
      %88 = vector.load %arg10[%c84, %c0_72] : memref<112x256xbf16, #tpu.memory_space<vmem>>, vector<4x256xbf16>
      tpu.vector_store %arg10[%c84, %c0_72], %87 {strides = array<i32>} : memref<112x256xbf16, #tpu.memory_space<vmem>>, vector<4x256xbf16>,
      %89 = arith.truncf %86 : vector<8x256xf32> to vector<8x256xbf16>
      %c88 = arith.constant 88 : index
      %c0_73 = arith.constant 0 : index
      %90 = vector.load %arg10[%c88, %c0_73] : memref<112x256xbf16, #tpu.memory_space<vmem>>, vector<8x256xbf16>
      tpu.vector_store %arg10[%c88, %c0_73], %89 {strides = array<i32>} : memref<112x256xbf16, #tpu.memory_space<vmem>>, vector<8x256xbf16>,
      %c2 = arith.constant 2 : index
      %c0_74 = arith.constant 0 : index
      %c0_75 = arith.constant 0 : index
      %91 = vector.load %arg2[%c2, %c0_74, %c0_75] : memref<3x8x256xf32, #tpu.memory_space<vmem>>, vector<1x8x256xf32>
      %92 = vector.shape_cast %91 : vector<1x8x256xf32> to vector<8x256xf32>
      %93 = vector.extract_strided_slice %92 {offsets = [0, 0], sizes = [4, 256], strides = [1, 1]} : vector<8x256xf32> to vector<4x256xf32>
      %c0_76 = arith.constant 0 : index
      %94 = arith.index_cast %27 : i32 to index
      %c0_77 = arith.constant 0 : index
      %c113 = arith.constant 113 : index
      %95 = vector.load %arg1[%c0_76, %94, %c0_77, %c113] : memref<1x4x4x512xf32, #tpu.memory_space<vmem>>, vector<1x1x4x256xf32>
      %96 = vector.shape_cast %95 : vector<1x1x4x256xf32> to vector<1x4x256xf32>
      %97 = vector.shape_cast %96 : vector<1x4x256xf32> to vector<4x256xf32>
      %c0_78 = arith.constant 0 : index
      %c113_79 = arith.constant 113 : index
      %98 = vector.load %arg8[%c0_78, %c113_79] : memref<8x512xf32, #tpu.memory_space<vmem>>, vector<8x256xf32>
      %99 = arith.mulf %97, %93 : vector<4x256xf32>
      %100 = arith.mulf %98, %92 : vector<8x256xf32>
      %101 = arith.truncf %99 : vector<4x256xf32> to vector<4x256xbf16>
      %c24 = arith.constant 24 : index
      %c0_80 = arith.constant 0 : index
      %102 = vector.load %arg10[%c24, %c0_80] : memref<112x256xbf16, #tpu.memory_space<vmem>>, vector<4x256xbf16>
      tpu.vector_store %arg10[%c24, %c0_80], %101 {strides = array<i32>} : memref<112x256xbf16, #tpu.memory_space<vmem>>, vector<4x256xbf16>,
      %103 = arith.truncf %100 : vector<8x256xf32> to vector<8x256xbf16>
      %c28 = arith.constant 28 : index
      %c0_81 = arith.constant 0 : index
      %104 = vector.load %arg10[%c28, %c0_81] : memref<112x256xbf16, #tpu.memory_space<vmem>>, vector<8x256xbf16>
      tpu.vector_store %arg10[%c28, %c0_81], %103 {strides = array<i32>} : memref<112x256xbf16, #tpu.memory_space<vmem>>, vector<8x256xbf16>,
      %c0_82 = arith.constant 0 : index
      %105 = arith.index_cast %27 : i32 to index
      %c0_83 = arith.constant 0 : index
      %c129 = arith.constant 129 : index
      %106 = vector.load %arg1[%c0_82, %105, %c0_83, %c129] : memref<1x4x4x512xf32, #tpu.memory_space<vmem>>, vector<1x1x4x256xf32>
      %107 = vector.shape_cast %106 : vector<1x1x4x256xf32> to vector<1x4x256xf32>
      %108 = vector.shape_cast %107 : vector<1x4x256xf32> to vector<4x256xf32>
      %c0_84 = arith.constant 0 : index
      %c129_85 = arith.constant 129 : index
      %109 = vector.load %arg8[%c0_84, %c129_85] : memref<8x512xf32, #tpu.memory_space<vmem>>, vector<8x256xf32>
      %110 = arith.mulf %108, %93 : vector<4x256xf32>
      %111 = arith.mulf %109, %92 : vector<8x256xf32>
      %112 = arith.truncf %110 : vector<4x256xf32> to vector<4x256xbf16>
      %c60 = arith.constant 60 : index
      %c0_86 = arith.constant 0 : index
      %113 = vector.load %arg10[%c60, %c0_86] : memref<112x256xbf16, #tpu.memory_space<vmem>>, vector<4x256xbf16>
      tpu.vector_store %arg10[%c60, %c0_86], %112 {strides = array<i32>} : memref<112x256xbf16, #tpu.memory_space<vmem>>, vector<4x256xbf16>,
      %114 = arith.truncf %111 : vector<8x256xf32> to vector<8x256xbf16>
      %c64 = arith.constant 64 : index
      %c0_87 = arith.constant 0 : index
      %115 = vector.load %arg10[%c64, %c0_87] : memref<112x256xbf16, #tpu.memory_space<vmem>>, vector<8x256xbf16>
      tpu.vector_store %arg10[%c64, %c0_87], %114 {strides = array<i32>} : memref<112x256xbf16, #tpu.memory_space<vmem>>, vector<8x256xbf16>,
      %c0_88 = arith.constant 0 : index
      %116 = arith.index_cast %27 : i32 to index
      %c0_89 = arith.constant 0 : index
      %c145 = arith.constant 145 : index
      %117 = vector.load %arg1[%c0_88, %116, %c0_89, %c145] : memref<1x4x4x512xf32, #tpu.memory_space<vmem>>, vector<1x1x4x256xf32>
      %118 = vector.shape_cast %117 : vector<1x1x4x256xf32> to vector<1x4x256xf32>
      %119 = vector.shape_cast %118 : vector<1x4x256xf32> to vector<4x256xf32>
      %c0_90 = arith.constant 0 : index
      %c145_91 = arith.constant 145 : index
      %120 = vector.load %arg8[%c0_90, %c145_91] : memref<8x512xf32, #tpu.memory_space<vmem>>, vector<8x256xf32>
      %121 = arith.mulf %119, %93 : vector<4x256xf32>
      %122 = arith.mulf %120, %92 : vector<8x256xf32>
      %123 = arith.truncf %121 : vector<4x256xf32> to vector<4x256xbf16>
      %c96 = arith.constant 96 : index
      %c0_92 = arith.constant 0 : index
      %124 = vector.load %arg10[%c96, %c0_92] : memref<112x256xbf16, #tpu.memory_space<vmem>>, vector<4x256xbf16>
      tpu.vector_store %arg10[%c96, %c0_92], %123 {strides = array<i32>} : memref<112x256xbf16, #tpu.memory_space<vmem>>, vector<4x256xbf16>,
      %125 = arith.truncf %122 : vector<8x256xf32> to vector<8x256xbf16>
      %c100 = arith.constant 100 : index
      %c0_93 = arith.constant 0 : index
      %126 = vector.load %arg10[%c100, %c0_93] : memref<112x256xbf16, #tpu.memory_space<vmem>>, vector<8x256xbf16>
      tpu.vector_store %arg10[%c100, %c0_93], %125 {strides = array<i32>} : memref<112x256xbf16, #tpu.memory_space<vmem>>, vector<8x256xbf16>,
      %c0_94 = arith.constant 0 : index
      %c0_95 = arith.constant 0 : index
      %127 = vector.load %arg3[%c0_94, %c0_95] : memref<32x112xbf16, #tpu.memory_space<vmem>>, vector<32x112xbf16>
      %c0_96 = arith.constant 0 : index
      %c0_97 = arith.constant 0 : index
      %128 = vector.load %arg10[%c0_96, %c0_97] : memref<112x256xbf16, #tpu.memory_space<vmem>>, vector<112x256xbf16>
      %cst_98 = arith.constant dense<0.000000e+00> : vector<32x256xf32>
      %129 = tpu.matmul %127, %128, %cst_98 {dimension_numbers = #tpu.dot_dimension_numbers<[1], [0], [0], [1], [0, 0, 1, 1], [], []>} : vector<32x112xbf16>, vector<112x256xbf16>, vector<32x256xf32> -> vector<32x256xf32>
      %130 = vector.extract_strided_slice %129 {offsets = [0, 0], sizes = [8, 256], strides = [1, 1]} : vector<32x256xf32> to vector<8x256xf32>
      %131 = arith.negf %130 : vector<8x256xf32>
      %132 = math.exp %131 : vector<8x256xf32>
      %cst_99 = arith.constant 1.000000e+00 : f32
      %133 = vector.broadcast %cst_99 : f32 to vector<8x256xf32>
      %134 = arith.addf %133, %132 : vector<8x256xf32>
      %135 = arith.divf %133, %134 : vector<8x256xf32>
      %136 = vector.extract_strided_slice %129 {offsets = [8, 0], sizes = [8, 256], strides = [1, 1]} : vector<32x256xf32> to vector<8x256xf32>
      %137 = arith.negf %136 : vector<8x256xf32>
      %138 = math.exp %137 : vector<8x256xf32>
      %cst_100 = arith.constant 1.000000e+00 : f32
      %139 = vector.broadcast %cst_100 : f32 to vector<8x256xf32>
      %140 = arith.addf %139, %138 : vector<8x256xf32>
      %141 = arith.divf %139, %140 : vector<8x256xf32>
      %142 = vector.extract_strided_slice %129 {offsets = [16, 0], sizes = [8, 256], strides = [1, 1]} : vector<32x256xf32> to vector<8x256xf32>
      %143 = arith.negf %142 : vector<8x256xf32>
      %144 = math.exp %143 : vector<8x256xf32>
      %cst_101 = arith.constant 1.000000e+00 : f32
      %145 = vector.broadcast %cst_101 : f32 to vector<8x256xf32>
      %146 = arith.addf %145, %144 : vector<8x256xf32>
      %147 = arith.divf %145, %146 : vector<8x256xf32>
      %148 = vector.extract_strided_slice %129 {offsets = [24, 0], sizes = [8, 256], strides = [1, 1]} : vector<32x256xf32> to vector<8x256xf32>
      %149 = math.tanh %148 : vector<8x256xf32>
      %c0_102 = arith.constant 0 : index
      %c0_103 = arith.constant 0 : index
      %150 = vector.load %arg9[%c0_102, %c0_103] : memref<8x256xf32, #tpu.memory_space<vmem>>, vector<8x256xf32>
      %151 = arith.mulf %141, %150 : vector<8x256xf32>
      %152 = arith.mulf %135, %149 : vector<8x256xf32>
      %153 = arith.addf %151, %152 : vector<8x256xf32>
      %154 = math.tanh %153 : vector<8x256xf32>
      %155 = arith.mulf %147, %154 : vector<8x256xf32>
      %c0_104 = arith.constant 0 : index
      %c0_105 = arith.constant 0 : index
      %156 = vector.load %arg9[%c0_104, %c0_105] : memref<8x256xf32, #tpu.memory_space<vmem>>, vector<8x256xf32>
      tpu.vector_store %arg9[%c0_104, %c0_105], %153 {strides = array<i32>} : memref<8x256xf32, #tpu.memory_space<vmem>>, vector<8x256xf32>,
      %c0_106 = arith.constant 0 : index
      %c128_107 = arith.constant 128 : index
      %157 = vector.load %arg8[%c0_106, %c128_107] : memref<8x512xf32, #tpu.memory_space<vmem>>, vector<8x256xf32>
      tpu.vector_store %arg8[%c0_106, %c128_107], %155 {strides = array<i32>} : memref<8x512xf32, #tpu.memory_space<vmem>>, vector<8x256xf32>,
      %c0_108 = arith.constant 0 : index
      %c0_109 = arith.constant 0 : index
      %c0_110 = arith.constant 0 : index
      %158 = vector.load %arg2[%c0_108, %c0_109, %c0_110] : memref<3x8x256xf32, #tpu.memory_space<vmem>>, vector<1x8x256xf32>
      %159 = vector.shape_cast %158 : vector<1x8x256xf32> to vector<8x256xf32>
      %c0_111 = arith.constant 0 : index
      %c111_112 = arith.constant 111 : index
      %160 = vector.load %arg8[%c0_111, %c111_112] : memref<8x512xf32, #tpu.memory_space<vmem>>, vector<8x256xf32>
      %c0_113 = arith.constant 0 : index
      %c111_114 = arith.constant 111 : index
      %161 = vector.load %arg11[%c0_113, %c111_114] : memref<8x512xf32, #tpu.memory_space<vmem>>, vector<8x256xf32>
      %162 = arith.mulf %160, %159 : vector<8x256xf32>
      %163 = arith.mulf %161, %159 : vector<8x256xf32>
      %164 = arith.truncf %162 : vector<8x256xf32> to vector<8x256xbf16>
      %c0_115 = arith.constant 0 : index
      %c0_116 = arith.constant 0 : index
      %165 = vector.load %arg13[%c0_115, %c0_116] : memref<152x256xbf16, #tpu.memory_space<vmem>>, vector<8x256xbf16>
      tpu.vector_store %arg13[%c0_115, %c0_116], %164 {strides = array<i32>} : memref<152x256xbf16, #tpu.memory_space<vmem>>, vector<8x256xbf16>,
      %166 = arith.truncf %163 : vector<8x256xf32> to vector<8x256xbf16>
      %c8 = arith.constant 8 : index
      %c0_117 = arith.constant 0 : index
      %167 = vector.load %arg13[%c8, %c0_117] : memref<152x256xbf16, #tpu.memory_space<vmem>>, vector<8x256xbf16>
      tpu.vector_store %arg13[%c8, %c0_117], %166 {strides = array<i32>} : memref<152x256xbf16, #tpu.memory_space<vmem>>, vector<8x256xbf16>,
      %c0_118 = arith.constant 0 : index
      %c127_119 = arith.constant 127 : index
      %168 = vector.load %arg8[%c0_118, %c127_119] : memref<8x512xf32, #tpu.memory_space<vmem>>, vector<8x256xf32>
      %c0_120 = arith.constant 0 : index
      %c127_121 = arith.constant 127 : index
      %169 = vector.load %arg11[%c0_120, %c127_121] : memref<8x512xf32, #tpu.memory_space<vmem>>, vector<8x256xf32>
      %170 = arith.mulf %168, %159 : vector<8x256xf32>
      %171 = arith.mulf %169, %159 : vector<8x256xf32>
      %172 = arith.truncf %170 : vector<8x256xf32> to vector<8x256xbf16>
      %c48_122 = arith.constant 48 : index
      %c0_123 = arith.constant 0 : index
      %173 = vector.load %arg13[%c48_122, %c0_123] : memref<152x256xbf16, #tpu.memory_space<vmem>>, vector<8x256xbf16>
      tpu.vector_store %arg13[%c48_122, %c0_123], %172 {strides = array<i32>} : memref<152x256xbf16, #tpu.memory_space<vmem>>, vector<8x256xbf16>,
      %174 = arith.truncf %171 : vector<8x256xf32> to vector<8x256xbf16>
      %c56 = arith.constant 56 : index
      %c0_124 = arith.constant 0 : index
      %175 = vector.load %arg13[%c56, %c0_124] : memref<152x256xbf16, #tpu.memory_space<vmem>>, vector<8x256xbf16>
      tpu.vector_store %arg13[%c56, %c0_124], %174 {strides = array<i32>} : memref<152x256xbf16, #tpu.memory_space<vmem>>, vector<8x256xbf16>,
      %c0_125 = arith.constant 0 : index
      %c143_126 = arith.constant 143 : index
      %176 = vector.load %arg8[%c0_125, %c143_126] : memref<8x512xf32, #tpu.memory_space<vmem>>, vector<8x256xf32>
      %c0_127 = arith.constant 0 : index
      %c143_128 = arith.constant 143 : index
      %177 = vector.load %arg11[%c0_127, %c143_128] : memref<8x512xf32, #tpu.memory_space<vmem>>, vector<8x256xf32>
      %178 = arith.mulf %176, %159 : vector<8x256xf32>
      %179 = arith.mulf %177, %159 : vector<8x256xf32>
      %180 = arith.truncf %178 : vector<8x256xf32> to vector<8x256xbf16>
      %c96_129 = arith.constant 96 : index
      %c0_130 = arith.constant 0 : index
      %181 = vector.load %arg13[%c96_129, %c0_130] : memref<152x256xbf16, #tpu.memory_space<vmem>>, vector<8x256xbf16>
      tpu.vector_store %arg13[%c96_129, %c0_130], %180 {strides = array<i32>} : memref<152x256xbf16, #tpu.memory_space<vmem>>, vector<8x256xbf16>,
      %182 = arith.truncf %179 : vector<8x256xf32> to vector<8x256xbf16>
      %c104 = arith.constant 104 : index
      %c0_131 = arith.constant 0 : index
      %183 = vector.load %arg13[%c104, %c0_131] : memref<152x256xbf16, #tpu.memory_space<vmem>>, vector<8x256xbf16>
      tpu.vector_store %arg13[%c104, %c0_131], %182 {strides = array<i32>} : memref<152x256xbf16, #tpu.memory_space<vmem>>, vector<8x256xbf16>,
      %c0_132 = arith.constant 0 : index
      %c112_133 = arith.constant 112 : index
      %184 = vector.load %arg8[%c0_132, %c112_133] : memref<8x512xf32, #tpu.memory_space<vmem>>, vector<8x256xf32>
      %c0_134 = arith.constant 0 : index
      %c112_135 = arith.constant 112 : index
      %185 = vector.load %arg11[%c0_134, %c112_135] : memref<8x512xf32, #tpu.memory_space<vmem>>, vector<8x256xf32>
      %186 = arith.truncf %184 : vector<8x256xf32> to vector<8x256xbf16>
      %c16_136 = arith.constant 16 : index
      %c0_137 = arith.constant 0 : index
      %187 = vector.load %arg13[%c16_136, %c0_137] : memref<152x256xbf16, #tpu.memory_space<vmem>>, vector<8x256xbf16>
      tpu.vector_store %arg13[%c16_136, %c0_137], %186 {strides = array<i32>} : memref<152x256xbf16, #tpu.memory_space<vmem>>, vector<8x256xbf16>,
      %188 = arith.truncf %185 : vector<8x256xf32> to vector<8x256xbf16>
      %c24_138 = arith.constant 24 : index
      %c0_139 = arith.constant 0 : index
      %189 = vector.load %arg13[%c24_138, %c0_139] : memref<152x256xbf16, #tpu.memory_space<vmem>>, vector<8x256xbf16>
      tpu.vector_store %arg13[%c24_138, %c0_139], %188 {strides = array<i32>} : memref<152x256xbf16, #tpu.memory_space<vmem>>, vector<8x256xbf16>,
      %c0_140 = arith.constant 0 : index
      %c128_141 = arith.constant 128 : index
      %190 = vector.load %arg8[%c0_140, %c128_141] : memref<8x512xf32, #tpu.memory_space<vmem>>, vector<8x256xf32>
      %c0_142 = arith.constant 0 : index
      %c128_143 = arith.constant 128 : index
      %191 = vector.load %arg11[%c0_142, %c128_143] : memref<8x512xf32, #tpu.memory_space<vmem>>, vector<8x256xf32>
      %192 = arith.truncf %190 : vector<8x256xf32> to vector<8x256xbf16>
      %c64_144 = arith.constant 64 : index
      %c0_145 = arith.constant 0 : index
      %193 = vector.load %arg13[%c64_144, %c0_145] : memref<152x256xbf16, #tpu.memory_space<vmem>>, vector<8x256xbf16>
      tpu.vector_store %arg13[%c64_144, %c0_145], %192 {strides = array<i32>} : memref<152x256xbf16, #tpu.memory_space<vmem>>, vector<8x256xbf16>,
      %194 = arith.truncf %191 : vector<8x256xf32> to vector<8x256xbf16>
      %c72_146 = arith.constant 72 : index
      %c0_147 = arith.constant 0 : index
      %195 = vector.load %arg13[%c72_146, %c0_147] : memref<152x256xbf16, #tpu.memory_space<vmem>>, vector<8x256xbf16>
      tpu.vector_store %arg13[%c72_146, %c0_147], %194 {strides = array<i32>} : memref<152x256xbf16, #tpu.memory_space<vmem>>, vector<8x256xbf16>,
      %c0_148 = arith.constant 0 : index
      %c144_149 = arith.constant 144 : index
      %196 = vector.load %arg8[%c0_148, %c144_149] : memref<8x512xf32, #tpu.memory_space<vmem>>, vector<8x256xf32>
      %c0_150 = arith.constant 0 : index
      %c144_151 = arith.constant 144 : index
      %197 = vector.load %arg11[%c0_150, %c144_151] : memref<8x512xf32, #tpu.memory_space<vmem>>, vector<8x256xf32>
      %198 = arith.truncf %196 : vector<8x256xf32> to vector<8x256xbf16>
      %c112_152 = arith.constant 112 : index
      %c0_153 = arith.constant 0 : index
      %199 = vector.load %arg13[%c112_152, %c0_153] : memref<152x256xbf16, #tpu.memory_space<vmem>>, vector<8x256xbf16>
      tpu.vector_store %arg13[%c112_152, %c0_153], %198 {strides = array<i32>} : memref<152x256xbf16, #tpu.memory_space<vmem>>, vector<8x256xbf16>,
      %200 = arith.truncf %197 : vector<8x256xf32> to vector<8x256xbf16>
      %c120 = arith.constant 120 : index
      %c0_154 = arith.constant 0 : index
      %201 = vector.load %arg13[%c120, %c0_154] : memref<152x256xbf16, #tpu.memory_space<vmem>>, vector<8x256xbf16>
      tpu.vector_store %arg13[%c120, %c0_154], %200 {strides = array<i32>} : memref<152x256xbf16, #tpu.memory_space<vmem>>, vector<8x256xbf16>,
      %c2_155 = arith.constant 2 : index
      %c0_156 = arith.constant 0 : index
      %c0_157 = arith.constant 0 : index
      %202 = vector.load %arg2[%c2_155, %c0_156, %c0_157] : memref<3x8x256xf32, #tpu.memory_space<vmem>>, vector<1x8x256xf32>
      %203 = vector.shape_cast %202 : vector<1x8x256xf32> to vector<8x256xf32>
      %c0_158 = arith.constant 0 : index
      %c113_159 = arith.constant 113 : index
      %204 = vector.load %arg8[%c0_158, %c113_159] : memref<8x512xf32, #tpu.memory_space<vmem>>, vector<8x256xf32>
      %c0_160 = arith.constant 0 : index
      %c113_161 = arith.constant 113 : index
      %205 = vector.load %arg11[%c0_160, %c113_161] : memref<8x512xf32, #tpu.memory_space<vmem>>, vector<8x256xf32>
      %206 = arith.mulf %204, %203 : vector<8x256xf32>
      %207 = arith.mulf %205, %203 : vector<8x256xf32>
      %208 = arith.truncf %206 : vector<8x256xf32> to vector<8x256xbf16>
      %c32 = arith.constant 32 : index
      %c0_162 = arith.constant 0 : index
      %209 = vector.load %arg13[%c32, %c0_162] : memref<152x256xbf16, #tpu.memory_space<vmem>>, vector<8x256xbf16>
      tpu.vector_store %arg13[%c32, %c0_162], %208 {strides = array<i32>} : memref<152x256xbf16, #tpu.memory_space<vmem>>, vector<8x256xbf16>,
      %210 = arith.truncf %207 : vector<8x256xf32> to vector<8x256xbf16>
      %c40_163 = arith.constant 40 : index
      %c0_164 = arith.constant 0 : index
      %211 = vector.load %arg13[%c40_163, %c0_164] : memref<152x256xbf16, #tpu.memory_space<vmem>>, vector<8x256xbf16>
      tpu.vector_store %arg13[%c40_163, %c0_164], %210 {strides = array<i32>} : memref<152x256xbf16, #tpu.memory_space<vmem>>, vector<8x256xbf16>,
      %c0_165 = arith.constant 0 : index
      %c129_166 = arith.constant 129 : index
      %212 = vector.load %arg8[%c0_165, %c129_166] : memref<8x512xf32, #tpu.memory_space<vmem>>, vector<8x256xf32>
      %c0_167 = arith.constant 0 : index
      %c129_168 = arith.constant 129 : index
      %213 = vector.load %arg11[%c0_167, %c129_168] : memref<8x512xf32, #tpu.memory_space<vmem>>, vector<8x256xf32>
      %214 = arith.mulf %212, %203 : vector<8x256xf32>
      %215 = arith.mulf %213, %203 : vector<8x256xf32>
      %216 = arith.truncf %214 : vector<8x256xf32> to vector<8x256xbf16>
      %c80 = arith.constant 80 : index
      %c0_169 = arith.constant 0 : index
      %217 = vector.load %arg13[%c80, %c0_169] : memref<152x256xbf16, #tpu.memory_space<vmem>>, vector<8x256xbf16>
      tpu.vector_store %arg13[%c80, %c0_169], %216 {strides = array<i32>} : memref<152x256xbf16, #tpu.memory_space<vmem>>, vector<8x256xbf16>,
      %218 = arith.truncf %215 : vector<8x256xf32> to vector<8x256xbf16>
      %c88_170 = arith.constant 88 : index
      %c0_171 = arith.constant 0 : index
      %219 = vector.load %arg13[%c88_170, %c0_171] : memref<152x256xbf16, #tpu.memory_space<vmem>>, vector<8x256xbf16>
      tpu.vector_store %arg13[%c88_170, %c0_171], %218 {strides = array<i32>} : memref<152x256xbf16, #tpu.memory_space<vmem>>, vector<8x256xbf16>,
      %c0_172 = arith.constant 0 : index
      %c145_173 = arith.constant 145 : index
      %220 = vector.load %arg8[%c0_172, %c145_173] : memref<8x512xf32, #tpu.memory_space<vmem>>, vector<8x256xf32>
      %c0_174 = arith.constant 0 : index
      %c145_175 = arith.constant 145 : index
      %221 = vector.load %arg11[%c0_174, %c145_175] : memref<8x512xf32, #tpu.memory_space<vmem>>, vector<8x256xf32>
      %222 = arith.mulf %220, %203 : vector<8x256xf32>
      %223 = arith.mulf %221, %203 : vector<8x256xf32>
      %224 = arith.truncf %222 : vector<8x256xf32> to vector<8x256xbf16>
      %c128_176 = arith.constant 128 : index
      %c0_177 = arith.constant 0 : index
      %225 = vector.load %arg13[%c128_176, %c0_177] : memref<152x256xbf16, #tpu.memory_space<vmem>>, vector<8x256xbf16>
      tpu.vector_store %arg13[%c128_176, %c0_177], %224 {strides = array<i32>} : memref<152x256xbf16, #tpu.memory_space<vmem>>, vector<8x256xbf16>,
      %226 = arith.truncf %223 : vector<8x256xf32> to vector<8x256xbf16>
      %c136 = arith.constant 136 : index
      %c0_178 = arith.constant 0 : index
      %227 = vector.load %arg13[%c136, %c0_178] : memref<152x256xbf16, #tpu.memory_space<vmem>>, vector<8x256xbf16>
      tpu.vector_store %arg13[%c136, %c0_178], %226 {strides = array<i32>} : memref<152x256xbf16, #tpu.memory_space<vmem>>, vector<8x256xbf16>,
      %c0_179 = arith.constant 0 : index
      %c0_180 = arith.constant 0 : index
      %228 = vector.load %arg4[%c0_179, %c0_180] : memref<32x152xbf16, #tpu.memory_space<vmem>>, vector<32x152xbf16>
      %c0_181 = arith.constant 0 : index
      %c0_182 = arith.constant 0 : index
      %229 = vector.load %arg13[%c0_181, %c0_182] : memref<152x256xbf16, #tpu.memory_space<vmem>>, vector<152x256xbf16>
      %cst_183 = arith.constant dense<0.000000e+00> : vector<32x256xf32>
      %230 = tpu.matmul %228, %229, %cst_183 {dimension_numbers = #tpu.dot_dimension_numbers<[1], [0], [0], [1], [0, 0, 1, 1], [], []>} : vector<32x152xbf16>, vector<152x256xbf16>, vector<32x256xf32> -> vector<32x256xf32>
      %231 = vector.extract_strided_slice %230 {offsets = [0, 0], sizes = [8, 256], strides = [1, 1]} : vector<32x256xf32> to vector<8x256xf32>
      %232 = arith.negf %231 : vector<8x256xf32>
      %233 = math.exp %232 : vector<8x256xf32>
      %cst_184 = arith.constant 1.000000e+00 : f32
      %234 = vector.broadcast %cst_184 : f32 to vector<8x256xf32>
      %235 = arith.addf %234, %233 : vector<8x256xf32>
      %236 = arith.divf %234, %235 : vector<8x256xf32>
      %237 = vector.extract_strided_slice %230 {offsets = [8, 0], sizes = [8, 256], strides = [1, 1]} : vector<32x256xf32> to vector<8x256xf32>
      %238 = arith.negf %237 : vector<8x256xf32>
      %239 = math.exp %238 : vector<8x256xf32>
      %cst_185 = arith.constant 1.000000e+00 : f32
      %240 = vector.broadcast %cst_185 : f32 to vector<8x256xf32>
      %241 = arith.addf %240, %239 : vector<8x256xf32>
      %242 = arith.divf %240, %241 : vector<8x256xf32>
      %243 = vector.extract_strided_slice %230 {offsets = [16, 0], sizes = [8, 256], strides = [1, 1]} : vector<32x256xf32> to vector<8x256xf32>
      %244 = arith.negf %243 : vector<8x256xf32>
      %245 = math.exp %244 : vector<8x256xf32>
      %cst_186 = arith.constant 1.000000e+00 : f32
      %246 = vector.broadcast %cst_186 : f32 to vector<8x256xf32>
      %247 = arith.addf %246, %245 : vector<8x256xf32>
      %248 = arith.divf %246, %247 : vector<8x256xf32>
      %249 = vector.extract_strided_slice %230 {offsets = [24, 0], sizes = [8, 256], strides = [1, 1]} : vector<32x256xf32> to vector<8x256xf32>
      %250 = math.tanh %249 : vector<8x256xf32>
      %c0_187 = arith.constant 0 : index
      %c0_188 = arith.constant 0 : index
      %251 = vector.load %arg12[%c0_187, %c0_188] : memref<8x256xf32, #tpu.memory_space<vmem>>, vector<8x256xf32>
      %252 = arith.mulf %242, %251 : vector<8x256xf32>
      %253 = arith.mulf %236, %250 : vector<8x256xf32>
      %254 = arith.addf %252, %253 : vector<8x256xf32>
      %255 = math.tanh %254 : vector<8x256xf32>
      %256 = arith.mulf %248, %255 : vector<8x256xf32>
      %c0_189 = arith.constant 0 : index
      %c0_190 = arith.constant 0 : index
      %257 = vector.load %arg12[%c0_189, %c0_190] : memref<8x256xf32, #tpu.memory_space<vmem>>, vector<8x256xf32>
      tpu.vector_store %arg12[%c0_189, %c0_190], %254 {strides = array<i32>} : memref<8x256xf32, #tpu.memory_space<vmem>>, vector<8x256xf32>,
      %c0_191 = arith.constant 0 : index
      %c128_192 = arith.constant 128 : index
      %258 = vector.load %arg11[%c0_191, %c128_192] : memref<8x512xf32, #tpu.memory_space<vmem>>, vector<8x256xf32>
      tpu.vector_store %arg11[%c0_191, %c128_192], %256 {strides = array<i32>} : memref<8x512xf32, #tpu.memory_space<vmem>>, vector<8x256xf32>,
    }
    %c4_i32_20 = arith.constant 4 : i32
    %c0_21 = arith.constant 0 : index
    %c128 = arith.constant 128 : index
    %17 = vector.load %arg11[%c0_21, %c128] : memref<8x512xf32, #tpu.memory_space<vmem>>, vector<8x256xf32>
    %c0_22 = arith.constant 0 : index
    %c0_23 = arith.constant 0 : index
    %18 = vector.load %arg5[%c0_22, %c0_23] : memref<3x8xf32, #tpu.memory_space<vmem>>, vector<3x8xf32>
    %cst_24 = arith.constant dense<0.000000e+00> : vector<3x256xf32>
    %19 = tpu.matmul %18, %17, %cst_24 {dimension_numbers = #tpu.dot_dimension_numbers<[1], [0], [0], [1], [0, 0, 1, 1], [], []>} : vector<3x8xf32>, vector<8x256xf32>, vector<3x256xf32> -> vector<3x256xf32>
    %c0_25 = arith.constant 0 : index
    %c0_26 = arith.constant 0 : index
    %20 = vector.load %arg6[%c0_25, %c0_26] : memref<3x1xf32, #tpu.memory_space<vmem>>, vector<3x1xf32>
    %21 = vector.broadcast %20 : vector<3x1xf32> to vector<3x256xf32>
    %22 = arith.addf %19, %21 : vector<3x256xf32>
    %c0_27 = arith.constant 0 : index
    %c0_28 = arith.constant 0 : index
    %c0_29 = arith.constant 0 : index
    %23 = vector.load %arg7[%c0_27, %c0_28, %c0_29] : memref<1x3x256xf32, #tpu.memory_space<vmem>>, vector<1x3x256xf32>
    %24 = vector.shape_cast %23 : vector<1x3x256xf32> to vector<3x256xf32>
    %25 = vector.shape_cast %22 : vector<3x256xf32> to vector<1x3x256xf32>
    tpu.vector_store %arg7[%c0_27, %c0_28, %c0_29], %25 {strides = array<i32>} : memref<1x3x256xf32, #tpu.memory_space<vmem>>, vector<1x3x256xf32>,
    return
  }
  func.func @transform_0(%arg0: i32) -> (i32, i32, i32, i32) {
    %c0_i32 = arith.constant 0 : i32
    %c0_i32_0 = arith.constant 0 : i32
    %c0_i32_1 = arith.constant 0 : i32
    %c0_i32_2 = arith.constant 0 : i32
    return %arg0, %c0_i32, %c0_i32_0, %c0_i32_1 : i32, i32, i32, i32
  }
  func.func @transform_1(%arg0: i32) -> (i32, i32, i32) {
    %c0_i32 = arith.constant 0 : i32
    %c0_i32_0 = arith.constant 0 : i32
    %c0_i32_1 = arith.constant 0 : i32
    %c0_i32_2 = arith.constant 0 : i32
    return %c0_i32, %c0_i32_0, %c0_i32_1 : i32, i32, i32
  }
  func.func @transform_2(%arg0: i32) -> (i32, i32) {
    %c0_i32 = arith.constant 0 : i32
    %c0_i32_0 = arith.constant 0 : i32
    %c0_i32_1 = arith.constant 0 : i32
    return %c0_i32, %c0_i32_0 : i32, i32
  }
  func.func @transform_3(%arg0: i32) -> (i32, i32) {
    %c0_i32 = arith.constant 0 : i32
    %c0_i32_0 = arith.constant 0 : i32
    %c0_i32_1 = arith.constant 0 : i32
    return %c0_i32, %c0_i32_0 : i32, i32
  }
  func.func @transform_4(%arg0: i32) -> (i32, i32) {
    %c0_i32 = arith.constant 0 : i32
    %c0_i32_0 = arith.constant 0 : i32
    %c0_i32_1 = arith.constant 0 : i32
    return %c0_i32, %c0_i32_0 : i32, i32
  }
  func.func @transform_5(%arg0: i32) -> (i32, i32) {
    %c0_i32 = arith.constant 0 : i32
    %c0_i32_0 = arith.constant 0 : i32
    %c0_i32_1 = arith.constant 0 : i32
    return %c0_i32, %c0_i32_0 : i32, i32
  }
  func.func @transform_6(%arg0: i32) -> (i32, i32, i32) {
    %c0_i32 = arith.constant 0 : i32
    %c0_i32_0 = arith.constant 0 : i32
    %c0_i32_1 = arith.constant 0 : i32
    return %arg0, %c0_i32, %c0_i32_0 : i32, i32, i32
  }
}

</mosaic_0001>

<bundles_post_ra>
// kernel: _lambda_.1
= control target key start
LH: loop header
LB: loop body
LE: loop exit
PB: predicated region body
PF: predicated region fallthrough
CT: control target
= control target key end

     0   :  { %s2231_s21 = smov 0   ;;  %s2876_s0 = inlined_call_operand.vmem [shape: f32[2,4,4,512], index: 0, kind: input, shape index: {}]   ;;  %s2877_s1 = inlined_call_operand.vmem [shape: f32[3,8,256], index: 1, kind: input, shape index: {}]   ;;  %s2878_s2 = inlined_call_operand.vmem [shape: bf16[32,112], index: 2, kind: input, shape index: {}]   ;;  %s2879_s3 = inlined_call_operand.vmem [shape: bf16[32,152], index: 3, kind: input, shape index: {}]   ;;  %s2880_s4 = inlined_call_operand.vmem [shape: f32[3,8], index: 4, kind: input, shape index: {}]   ;;  %s2881_s5 = inlined_call_operand.vmem [shape: f32[3,1], index: 5, kind: input, shape index: {}]   ;;  %s2882_s6 = inlined_call_operand.vmem [shape: f32[2,3,256], index: 6, kind: output, shape index: {}]  }
   0x1 LB: > { %s1927_s22 = sadd.s32 4294967295, %s2179_s21   ;;  %p1931_p0 = scmp.ge.s32.totalorder %s2179_s21, 1  ;;  %s2179_s21 = sphi %s2231_s21, %s16_s21  }
   0x2   : > { %p212_p1 = scmp.lt.s32.totalorder %s2179_s21, 3 }
   0x4   : > { %p213_p2 = pnand %p1931_p0, %p212_p1 }
   0x5   : > { %p2241_p3 = scmp.lt.s32.totalorder (!%p213_p2), %s1927_s22, 1  ;;  %v2185_v0 = vmov (!%p213_p2), 0   ;;  %v2186_v1 = vmov (!%p213_p2), 0.0   ;;  %vm308_vm0 = vcmask (!%p213_p2), 1040384   ;;  %vm309_vm1 = vsmask.f32 (!%p213_p2), 256 }
   0x6   : > { %216 = sbr.rel (%p213_p2) target bundleno = 1291 (0x50b), region = 44  ;;  %272 = vst [vmem:[#allocation4 + $0x60] sm:$0xff] (!%p213_p2), %v2185_v0  ;;  %260 = vst [vmem:[#allocation4] sm:$0xff] (!%p213_p2), %v2185_v0  ;;  %vm311_vm2 = vcmask (!%p213_p2), 1044484   ;;  %vm312_vm3 = vsmask.f32 (!%p213_p2), 4352 }
   0x7   : > { %261 = vst [vmem:[#allocation4 + $0x8] sm:$0xff] (!%p213_p2), %v2185_v0  ;;  %262 = vst [vmem:[#allocation4 + $0x10] sm:$0xff] (!%p213_p2), %v2185_v0  ;;  %vm274_vm4 = vcmask (!%p213_p2), 1046534   ;;  %vm275_vm5 = vsmask.f32 (!%p213_p2), 6400  ;;  %s2286_s8 = smov (!%p213_p2), 0  }
   0x8   : > { %263 = vst [vmem:[#allocation4 + $0x18] sm:$0xff] (!%p213_p2), %v2185_v0  ;;  %264 = vst [vmem:[#allocation4 + $0x20] sm:$0xff] (!%p213_p2), %v2185_v0 }
   0x9   : > { %265 = vst [vmem:[#allocation4 + $0x28] sm:$0xff] (!%p213_p2), %v2185_v0  ;;  %266 = vst [vmem:[#allocation4 + $0x30] sm:$0xff] (!%p213_p2), %v2185_v0 }
   0xa   : > { %267 = vst [vmem:[#allocation4 + $0x38] sm:$0xff] (!%p213_p2), %v2185_v0  ;;  %268 = vst [vmem:[#allocation4 + $0x40] sm:$0xff] (!%p213_p2), %v2185_v0 }
   0xb   : > { %269 = vst [vmem:[#allocation4 + $0x48] sm:$0xff] (!%p213_p2), %v2185_v0  ;;  %270 = vst [vmem:[#allocation4 + $0x50] sm:$0xff] (!%p213_p2), %v2185_v0 }
   0xc   : > { %271 = vst [vmem:[#allocation4 + $0x58] sm:$0xff] (!%p213_p2), %v2185_v0  ;;  %273 = vst [vmem:[#allocation4 + $0x68] sm:$0xff] (!%p213_p2), %v2185_v0 }
   0xd   : > { %307 = vst [vmem:[#allocation7 + $0x90] sm:$0xff] %v2185_v0  ;;  %254 = vst [vmem:[#allocation2] sm:$0xff] %v2186_v1  ;;  %s2885_s22 = smov (!%p2241_p3, %s1927_s22), 1  ;;  %v277_v2 = vld [vmem:[#allocation4 + $0x60] sm:$0x40] }
   0xe   : > { %255 = vst [vmem:[#allocation2 + $0x8] sm:$0xff] %v2186_v1  ;;  %256 = vst [vmem:[#allocation2 + $0x10] sm:$0xff] %v2186_v1  ;;  %s2022_s24 = sshll.u32 %s2885_s22, 6  ;;  %s2023_s25 = sshll.u32 %s2885_s22, 3 }
   0xf   : > { %257 = vst [vmem:[#allocation2 + $0x18] sm:$0xff] %v2186_v1  ;;  %258 = vst [vmem:[#allocation3] sm:$0xff] %v2186_v1  ;;  %s2279_s28 = scalar_lea.vmem %s2876_s0, %s2022_s24  ;;  %s2284_s7 = scalar_lea.vmem %s2882_s6, %s2023_s25 }
  0x10   : > { %259 = vst [vmem:[#allocation3 + $0x8] sm:$0xff] %v2186_v1  ;;  %283 = vst [vmem:[#allocation5] sm:$0xff] %v2186_v1 }
  0x11   : > { %284 = vst [vmem:[#allocation5 + $0x8] sm:$0xff] %v2186_v1  ;;  %285 = vst [vmem:[#allocation5 + $0x10] sm:$0xff] %v2186_v1 }
  0x12   : > { %286 = vst [vmem:[#allocation5 + $0x18] sm:$0xff] %v2186_v1  ;;  %287 = vst [vmem:[#allocation6] sm:$0xff] %v2186_v1 }
  0x13   : > { %288 = vst [vmem:[#allocation6 + $0x8] sm:$0xff] %v2186_v1  ;;  %vm310_vm6 = vmand %vm308_vm0, %vm309_vm1  ;;  %v280_v3 = vld [vmem:[#allocation4 + $0x68] sm:$0x40] }
  0x14   : > { %vm313_vm7 = vmand %vm311_vm2, %vm312_vm3  ;;  %v315_v4 = vld [vmem:[#allocation7 + $0x90] sm:$0x11] }
  0x15   : > { %vm276_vm8 = vmand %vm274_vm4, %vm275_vm5 }
  0x16   : > { %vm314_vm9 = vmor %vm313_vm7, %vm310_vm6  ;;  %v278_v5 = vsel %vm276_vm8, 1065369472, %v277_v2  ;;  %v281_v6 = vsel %vm276_vm8, 1065369472, %v280_v3 }
  0x17   : > { %v316_v7 = vsel %vm314_vm9, 1065369472, %v315_v4  ;;  %279 = vst [vmem:[#allocation4 + $0x60] sm:$0x40] %v278_v5  ;;  %282 = vst [vmem:[#allocation4 + $0x68] sm:$0x40] %v281_v6 }
  0x18   : > { %317 = vst [vmem:[#allocation7 + $0x90] sm:$0x11] %v316_v7 }
  0x19 LB: >> { %v2294_v8 = vld [vmem:[%s2877_s1 + $0x8] sm:$0xff]  ;;  %v2299_v9 = vld [vmem:[%s2877_s1] sm:$0xff]  ;;  %s2187_s15 = smov 111   ;;  %s2188_s18 = smov 113   ;;  %v2377_v32 = vld [vmem:[#allocation2 + $0x10] sm:$0xff]  ;;  %vm443_vm10 = vcmask 7168   ;;  %s2183_s8 = sphi %s2286_s8, %s323_s8  }
  0x1a   : >> { %v2304_v10 = vld [vmem:[%s2877_s1 + $0x20] sm:$0xff]  ;;  %348 = vrot.lane.b32.xlu1 %v2294_v8, %s2187_s15  ;;  %v336_v11 = vcombine.low %v2299_v9, %v2294_v8  ;;  %v2313_v12 = vld [vmem:[%s2877_s1 + $0x28] sm:$0xff]  ;;  %s2024_s19 = sshll.u32 %s2183_s8, 4  ;;  %s2189_s22 = smov 127   ;;  %v2382_v33 = vpack.c.bf16 %v2377_v32, %v2377_v32  ;;  %v2423_v57 = vld [vmem:[#allocation2 + $0x18] sm:$0xff]  ;;  %vm567_vm11 = vcmask 130048  }
  0x1b   : >> { %v673_v13 = vcombine.low %v2304_v10, %v2313_v12  ;;  %s2321_s20 = scalar_lea.vmem %s2279_s28, %s2024_s19  ;;  %s2190_s23 = smov 1   ;;  %v2362_v25 = vld [vmem:[#allocation2 + $0x8] sm:$0xff]  ;;  %v2371_v29 = vld [vmem:[#allocation2] sm:$0xff]  ;;  %vm340_vm12 = vcmask 908288   ;;  %vm408_vm13 = vcmask 1039360   ;;  %vm514_vm14 = vcmask 924672  }
  0x1c   : >> { %337 = vrot.lane.b32.xlu0 %v336_v11, %s2187_s15  ;;  %v2326_v14 = vld [vmem:[%s2321_s20 + $0x4] sm:$0xff]  ;;  %s2191_s24 = smov 15   ;;  %s2192_s25 = smov 17   ;;  %v2367_v26 = vpack.c.bf16 %v2362_v25, %v2362_v25  ;;  %v613_v27 = vld [vmem:[%s2321_s20 + $0xc] sm:$0xf]  ;;  %v574_v30 = vpack.c.bf16 %v2371_v29, %v2371_v29  ;;  %v649_v36 = vrot.slane %v2382_v33, 4 }
  0x1d   : >> { %v618_v15 = vcombine.high %v2326_v14, %v2326_v14  ;;  %v2344_v17 = vld [vmem:[%s2321_s20] sm:$0xff]  ;;  %v545_v18 = vld [vmem:[%s2321_s20 + $0x8] sm:$0xf]  ;;  %s2193_s26 = smov 16   ;;  %v622_v31 = vpack.c.bf16 %v613_v27, %v613_v27  ;;  %s2194_s27 = smov 112   ;;  %v2393_v37 = vpack.c.bf16 %v2326_v14, %v2326_v14  ;;  %vm635_vm15 = vcmask 916480  }
  0x1e   : >> { %674 = vrot.lane.b32.xlu1 %v673_v13, %s2188_s18  ;;  %v550_v19 = vcombine.high %v2344_v17, %v2344_v17  ;;  %v554_v20 = vpack.c.bf16 %v545_v18, %v545_v18  ;;  %v552_v24 = vpack.c.bf16 %v2344_v17, %v2344_v17  ;;  %vm479_vm0 = vcmask 121856   ;;  %s323_s8 = sadd.s32 1, %s2183_s8  }
  0x1f   : >> { %v621_v16 = vpack.c.bf16 %v618_v15, %v618_v15  ;;  %v628_v34 = vrot.slane %v622_v31, 6  ;;  %600 = vst [vmem:[#allocation4 + $0x30] sm:$0x3] %v2393_v37  ;;  %vm372_vm1 = vcmask 138240   ;;  %vm1061_vm2 = vcmask 1043456   ;;  %p320_p4 = scmp.ge.s32.totalorder %s323_s8, 4  }
  0x20   : >> { %346 = vrot.lane.b32.xlu0 %v2299_v9, %s2187_s15  ;;  %v553_v21 = vpack.c.bf16 %v550_v19, %v550_v19  ;;  %v560_v22 = vrot.slane %v554_v20, 2  ;;  %v558_v28 = vrot.slane %v552_v24, 2  ;;  %vm1655_vm3 = vcmask 195584  }
  0x21   : >> { %601 = vst [vmem:[#allocation4 + $0x38] sm:$0x3] %v621_v16  ;;  %v627_v35 = vrot.slane %v621_v16, 6  ;;  %vm1785_vm4 = vcmask (%p320_p4), 64512   ;;  %2166 = vset.pattern.permute.xlu0 (%p320_p4), %v2185_v0 }
  0x22   : >> { %683 = vrot.lane.b32.xlu1 %v2304_v10, %s2188_s18  ;;  %v559_v23 = vrot.slane %v553_v21, 2 }
  0x24   : >> { %405 = vrot.lane.b32.xlu0 %v336_v11, %s2189_s22 }
  0x26   : >> { %414 = vrot.lane.b32.xlu1 %v2299_v9, %s2189_s22 }
  0x28   : >> { %685 = vrot.lane.b32.xlu0 %v2313_v12, %s2188_s18 }
  0x2a   : >> { %747 = vrot.lane.b32.xlu1 %v673_v13, %s2190_s23 }
  0x2c   : >> { %416 = vrot.lane.b32.xlu0 %v2294_v8, %s2189_s22 }
  0x2e   : >> { %485 = vrot.lane.b32.xlu1 %v2299_v9, %s2191_s24 }
  0x30   : >> { %476 = vrot.lane.b32.xlu0 %v336_v11, %s2191_s24 }
  0x32   : >> { %756 = vrot.lane.b32.xlu1 %v2304_v10, %s2190_s23 }
  0x34   : >> { %487 = vrot.lane.b32.xlu0 %v2294_v8, %s2191_s24 }
  0x36   : >> { %815 = vrot.lane.b32.xlu1 %v673_v13, %s2192_s25 }
  0x38   : >> { %758 = vrot.lane.b32.xlu0 %v2313_v12, %s2190_s23 }
  0x3a   : >> { %826 = vrot.lane.b32.xlu1 %v2313_v12, %s2192_s25 }
  0x3c   : >> { %824 = vrot.lane.b32.xlu0 %v2304_v10, %s2192_s25 }
  0x3e   : >> { %565 = vrot.lane.b32.xlu1 %v560_v22, %s2193_s26 }
  0x40   : >> { %563 = vrot.lane.b32.xlu0 %v559_v23, %s2193_s26 }
  0x42   : >> { %582 = vrot.lane.b32.xlu1 %v2367_v26, %s2193_s26 }
  0x44   : >> { %561 = vrot.lane.b32.xlu0 %v558_v28, %s2193_s26 }
  0x46   : >> { %580 = vrot.lane.b32.xlu1 %v574_v30, %s2193_s26 }
  0x48   : >> { %584 = vrot.lane.b32.xlu0 %v2382_v33, %s2193_s26 }
  0x4a   : >> { %633 = vrot.lane.b32.xlu1 %v628_v34, %s2194_s27 }
  0x4c   : >> { %631 = vrot.lane.b32.xlu0 %v627_v35, %s2194_s27 }
  0x50   : >> { %653 = vrot.lane.b32.xlu0 %v649_v36, %s2194_s27 }
  0x8c   : >> { %v349_v38 = vpop.permute.xlu1 %348 }
  0x8d   : >> { %v356_v56 = vmul.f32 %v349_v38, %v2377_v32 }
  0x8e   : >> { %v2396_v39 = vpop.permute.xlu0 %337 }
  0x8f   : >> { %v381_v4 = vpack.c.bf16 %v356_v56, %v356_v56 }
  0x90   : >> { %v2398_v40 = vpop.permute.xlu1 %674 }
  0x91   : >> { %v387_v21 = vrot.slane %v381_v4, 6 }
  0x92   : >> { %v347_v41 = vpop.permute.xlu0 %346 }
  0x93   : >> { %v354_v5 = vmul.f32 %v347_v41, %v2371_v29  ;;  %v350_v18 = vsel %vm340_vm12, %v347_v41, %v349_v38 }
  0x94   : >> { %v2400_v42 = vpop.permute.xlu1 %683  ;;  %v355_v27 = vmul.f32 %v350_v18, %v2362_v25 }
  0x95   : >> { %v379_v19 = vpack.c.bf16 %v354_v5, %v354_v5  ;;  %v691_v20 = vmul.f32 %v2400_v42, %v2371_v29 }
  0x96   : >> { %v2402_v43 = vpop.permute.xlu0 %405 }
  0x97   : >> { %v719_v31 = vpack.c.bf16 %v691_v20, %v691_v20  ;;  %v385_v36 = vrot.slane %v379_v19, 6 }
  0x98   : >> { %v2404_v44 = vpop.permute.xlu1 %414 }
  0x9a   : >> { %v2406_v45 = vpop.permute.xlu0 %685 }
  0x9b   : >> { %v693_v55 = vmul.f32 %v2406_v45, %v2377_v32 }
  0x9c   : >> { %v2408_v46 = vpop.permute.xlu1 %747 }
  0x9d   : >> { %v721_v63 = vpack.c.bf16 %v693_v55, %v693_v55  ;;  %v380_v55 = vpack.c.bf16 %v355_v27, %v355_v27 }
  0x9e   : >> { %v417_v47 = vpop.permute.xlu0 %416 }
  0x9f   : >> { %v727_v16 = vrot.slane %v721_v63, 2  ;;  %v418_v34 = vsel %vm408_vm13, %v2404_v44, %v417_v47  ;;  %v424_v35 = vmul.f32 %v417_v47, %v2377_v32  ;;  %v422_v47 = vmul.f32 %v2404_v44, %v2371_v29 }
  0xa0   : >> { %v2410_v48 = vpop.permute.xlu1 %485  ;;  %v687_v63 = vsel %vm514_vm14, %v2400_v42, %v2406_v45  ;;  %v386_v29 = vrot.slane %v380_v55, 6  ;;  %v667_v42 = vld [vmem:[%s2321_s20 + $0x8] sm:$0xf]  ;;  %v743_v55 = vld [vmem:[%s2321_s20 + $0xc] sm:$0xf] }
  0xa1   : >> { %v493_v13 = vmul.f32 %v2410_v48, %v2362_v25  ;;  %v450_v5 = vpack.c.bf16 %v422_v47, %v422_v47 }
  0xa2   : >> { %v2412_v49 = vpop.permute.xlu0 %476 }
  0xa3   : >> { %v521_v28 = vpack.c.bf16 %v493_v13, %v493_v13  ;;  %v676_v13 = vrot.slane %v2398_v40, 4  ;;  %v478_v18 = vrot.slane %v2412_v49, 4 }
  0xa4   : >> { %v757_v50 = vpop.permute.xlu1 %756 }
  0xa5   : >> { %v764_v51 = vmul.f32 %v757_v50, %v2362_v25  ;;  %v682_v20 = vmul.f32 %v676_v13, %v667_v42 }
  0xa6   : >> { %v2415_v52 = vpop.permute.xlu0 %487 }
  0xa7   : >> { %v792_v53 = vpack.c.bf16 %v764_v51, %v764_v51  ;;  %v495_v2 = vmul.f32 %v2415_v52, %v2423_v57  ;;  %v423_v51 = vmul.f32 %v418_v34, %v2362_v25  ;;  %v330_v34 = vld [vmem:[%s2321_s20 + $0x8] sm:$0xf] }
  0xa8   : >> { %v2417_v54 = vpop.permute.xlu1 %815 }
  0xa9   : >> { %798 = vrot.lane.b32.xlu1 %v792_v53, %s2189_s22  ;;  %v523_v15 = vpack.c.bf16 %v495_v2, %v495_v2  ;;  %v527_v53 = vrot.slane %v521_v28, 2  ;;  %v451_v44 = vpack.c.bf16 %v423_v51, %v423_v51  ;;  %v407_v28 = vrot.slane %v2402_v43, 4 }
  0xaa   : >> { %v759_v58 = vpop.permute.xlu0 %758 }
  0xab   : >> { %v760_v59 = vsel %vm443_vm10, %v757_v50, %v759_v58  ;;  %v766_v60 = vmul.f32 %v759_v58, %v2423_v57  ;;  %v529_v30 = vrot.slane %v523_v15, 2  ;;  %v339_v58 = vrot.slane %v2396_v39, 4 }
  0xac   : >> { %v765_v61 = vmul.f32 %v760_v59, %v2377_v32  ;;  %v2428_v62 = vpop.permute.xlu1 %826  ;;  %v452_v59 = vpack.c.bf16 %v424_v35, %v424_v35  ;;  %v489_v15 = vsel %vm479_vm0, %v2410_v48, %v2415_v52  ;;  %v457_v19 = vrot.slane %v451_v44, 4  ;;  %v472_v52 = vld [vmem:[%s2321_s20 + $0xc] sm:$0xf]  ;;  %v401_v35 = vld [vmem:[%s2321_s20 + $0x8] sm:$0xf] }
  0xad   : >> { %v794_v3 = vpack.c.bf16 %v766_v60, %v766_v60  ;;  %v725_v60 = vrot.slane %v719_v31, 2  ;;  %v341_v4 = vsel %vm340_vm12, %v339_v58, %v2396_v39  ;;  %v484_v27 = vmul.f32 %v478_v18, %v472_v52 }
  0xae   : >> { %v793_v6 = vpack.c.bf16 %v765_v61, %v765_v61  ;;  %v2433_v7 = vpop.permute.xlu0 %824  ;;  %v344_v39 = vmul.f32 %v341_v4, %v2344_v17  ;;  %v345_v51 = vmul.f32 %v339_v58, %v330_v34  ;;  %v480_v58 = vsel %vm479_vm0, %v478_v18, %v2412_v49 }
  0xaf   : >> { %802 = vrot.lane.b32.xlu0 %v794_v3, %s2189_s22 }
  0xb0   : >> { %800 = vrot.lane.b32.xlu1 %v793_v6, %s2189_s22  ;;  %v566_v11 = vpop.permute.xlu1 %565  ;;  %v692_v6 = vmul.f32 %v687_v63, %v2362_v25  ;;  %v362_v63 = vpack.c.bf16 %v345_v51, %v345_v51  ;;  %v811_v51 = vld [vmem:[%s2321_s20 + $0xc] sm:$0xf] }
  0xb2   : >> { %v564_v22 = vpop.permute.xlu0 %563  ;;  %v720_v48 = vpack.c.bf16 %v692_v6, %v692_v6 }
  0xb3   : >> { %732 = vrot.lane.b32.xlu0 %v727_v16, %s2191_s24  ;;  %v569_v23 = vsel %vm567_vm11, %v564_v22, %v566_v11  ;;  %v458_v11 = vrot.slane %v452_v59, 4 }
  0xb4   : >> { %392 = vrot.lane.b32.xlu1 %v387_v21, %s2192_s25  ;;  %573 = vst [vmem:[#allocation4 + $0x8] sm:$0xc0] %v569_v23  ;;  %v583_v24 = vpop.permute.xlu1 %582  ;;  %v494_v21 = vmul.f32 %v489_v15, %v2377_v32  ;;  %v360_v23 = vpack.c.bf16 %v344_v39, %v344_v39  ;;  %v726_v31 = vrot.slane %v720_v48, 2  ;;  %v644_v48 = vpack.c.bf16 %v2423_v57, %v2423_v57 }
  0xb6   : >> { %v562_v38 = vpop.permute.xlu0 %561 }
  0xb7   : >> { %534 = vrot.lane.b32.xlu0 %v529_v30, %s2188_s18  ;;  %v568_v41 = vsel %vm567_vm11, %v562_v38, %v564_v22  ;;  %v456_v22 = vrot.slane %v450_v5, 4  ;;  %v522_v30 = vpack.c.bf16 %v494_v21, %v494_v21  ;;  %v501_v38 = vpack.c.bf16 %v484_v27, %v484_v27 }
  0xb8   : >> { %388 = vrot.lane.b32.xlu1 %v385_v36, %s2192_s25  ;;  %572 = vst [vmem:[#allocation4] sm:$0xc0] %v568_v41  ;;  %v581_v50 = vpop.permute.xlu1 %580  ;;  %v678_v41 = vsel %vm514_vm14, %v676_v13, %v2398_v40  ;;  %v483_v5 = vmul.f32 %v2326_v14, %v480_v58  ;;  %v606_v21 = vrot.slane %v2367_v26, 6 }
  0xb9   : >> { %v586_v56 = vsel %vm567_vm11, %v581_v50, %v583_v24  ;;  %v528_v50 = vrot.slane %v522_v30, 2  ;;  %v681_v47 = vmul.f32 %v678_v41, %v2344_v17  ;;  %v507_v59 = vrot.slane %v501_v38, 4 }
  0xba   : >> { %590 = vst [vmem:[#allocation4 + $0x10] sm:$0xf] %v586_v56  ;;  %v585_v61 = vpop.permute.xlu0 %584  ;;  %v749_v56 = vrot.slane %v2408_v46, 4  ;;  %v499_v15 = vpack.c.bf16 %v483_v5, %v483_v5  ;;  %610 = vst [vmem:[#allocation4 + $0x30] sm:$0x3c] %v606_v21  ;;  %v497_v34 = vcombine.high %v483_v5, %v483_v5  ;;  %v828_v38 = vsel %vm372_vm1, %v2433_v7, %v2428_v62 }
  0xbb   : >> { %530 = vrot.lane.b32.xlu0 %v527_v53, %s2188_s18  ;;  %v587_v2 = vsel %vm567_vm11, %v583_v24, %v585_v61  ;;  %v699_v24 = vpack.c.bf16 %v682_v20, %v682_v20  ;;  %v413_v53 = vmul.f32 %v407_v28, %v401_v35  ;;  %v409_v61 = vsel %vm408_vm13, %v407_v28, %v2402_v43 }
  0xbc   : >> { %728 = vrot.lane.b32.xlu1 %v725_v60, %s2191_s24  ;;  %591 = vst [vmem:[#allocation4 + $0x18] sm:$0xf] %v587_v2  ;;  %v634_v3 = vpop.permute.xlu1 %633  ;;  %v358_v60 = vcombine.high %v344_v39, %v344_v39  ;;  %v755_v40 = vmul.f32 %v749_v56, %v743_v55  ;;  %v697_v44 = vpack.c.bf16 %v681_v47, %v681_v47  ;;  %v505_v18 = vrot.slane %v499_v15, 4 }
  0xbd   : >> { %v705_v36 = vrot.slane %v699_v24, 4  ;;  %v430_v2 = vpack.c.bf16 %v413_v53, %v413_v53  ;;  %v751_v4 = vsel %vm443_vm10, %v749_v56, %v2408_v46  ;;  %v607_v20 = vrot.slane %v2382_v33, 6 }
  0xbe   : >> { %v2467_v45 = vpop.permute.xlu0 %631  ;;  %v772_v6 = vpack.c.bf16 %v755_v40, %v755_v40  ;;  %v754_v49 = vmul.f32 %v751_v4, %v2326_v14  ;;  %v650_v28 = vrot.slane %v644_v48, 4  ;;  %v626_v53 = vrot.slane %v2393_v37, 6 }
  0xbf   : >> { %390 = vrot.lane.b32.xlu0 %v386_v29, %s2192_s25  ;;  %v637_v16 = vsel %vm635_vm15, %v2467_v45, %v634_v3  ;;  %v412_v3 = vmul.f32 %v409_v61, %v2344_v17  ;;  %v361_v29 = vpack.c.bf16 %v358_v60, %v358_v60  ;;  %v436_v43 = vrot.slane %v430_v2, 6  ;;  %611 = vst [vmem:[#allocation4 + $0x38] sm:$0x3c] %v607_v20 }
  0xc0   : >> { %463 = vrot.lane.b32.xlu1 %v458_v11, %s2190_s23  ;;  %641 = vst [vmem:[#allocation4 + $0x58] sm:$0xc] %v637_v16  ;;  %v703_v11 = vrot.slane %v697_v44, 4  ;;  %v778_v13 = vrot.slane %v772_v6, 2  ;;  %v695_v17 = vcombine.high %v681_v47, %v681_v47  ;;  %v770_v16 = vpack.c.bf16 %v754_v49, %v754_v49 }
  0xc1   : >> { %v428_v42 = vpack.c.bf16 %v412_v3, %v412_v3  ;;  %v426_v39 = vcombine.high %v412_v3, %v412_v3  ;;  %v768_v24 = vcombine.high %v754_v49, %v754_v49  ;;  %v2195_v40 = vmov 0  }
  0xc2   : >> { %v776_v52 = vrot.slane %v770_v16, 2  ;;  %945 = vmatprep.mubr.bf16.mxu0 %v2195_v40 }
  0xc3   : >> { %461 = vrot.lane.b32.xlu0 %v457_v19, %s2190_s23  ;;  %v434_v46 = vrot.slane %v428_v42, 6  ;;  %v698_v19 = vpack.c.bf16 %v695_v17, %v695_v17 }
  0xc4   : >> { %459 = vrot.lane.b32.xlu1 %v456_v22, %s2190_s23  ;;  %v817_v22 = vrot.slane %v2417_v54, 4 }
  0xc5   : >> { %v704_v27 = vrot.slane %v698_v19, 4 }
  0xc6   : >> { %v819_v33 = vsel %vm372_vm1, %v817_v22, %v2417_v54  ;;  %v833_v54 = vmul.f32 %v828_v38, %v2377_v32  ;;  %v832_v32 = vmul.f32 %v2433_v7, %v2362_v25  ;;  %v2570_v25 = vpop.permute.xlu0 %653 }
  0xc7   : >> { %366 = vrot.lane.b32.xlu0 %v360_v23, %s2192_s25  ;;  %v429_v23 = vpack.c.bf16 %v426_v39, %v426_v39  ;;  %v822_v35 = vmul.f32 %v819_v33, %v2326_v14  ;;  %v834_v14 = vmul.f32 %v2428_v62, %v2423_v57 }
  0xc8   : >> { %730 = vrot.lane.b32.xlu1 %v726_v31, %s2191_s24  ;;  %v771_v31 = vpack.c.bf16 %v768_v24, %v768_v24  ;;  %v858_v47 = vpack.c.bf16 %v833_v54, %v833_v54  ;;  %v857_v62 = vpack.c.bf16 %v832_v32, %v832_v32 }
  0xc9   : >> { %v435_v30 = vrot.slane %v429_v23, 6  ;;  %v836_v55 = vcombine.high %v822_v35, %v822_v35  ;;  %v859_v60 = vpack.c.bf16 %v834_v14, %v834_v14  ;;  %v838_v2 = vpack.c.bf16 %v822_v35, %v822_v35 }
  0xca   : >> { %v777_v41 = vrot.slane %v771_v31, 2  ;;  %v864_v37 = vrot.slane %v858_v47, 6  ;;  %v863_v58 = vrot.slane %v857_v62, 6 }
  0xcb   : >> { %710 = vrot.lane.b32.xlu0 %v705_v36, %s2191_s24  ;;  %v648_v36 = vrot.slane %v2367_v26, 4  ;;  %v823_v26 = vmul.f32 %v817_v22, %v811_v51 }
  0xcc   : >> { %532 = vrot.lane.b32.xlu1 %v528_v50, %s2188_s18  ;;  %v500_v50 = vpack.c.bf16 %v497_v34, %v497_v34 }
  0xcd   : >> { %v840_v61 = vpack.c.bf16 %v823_v26, %v823_v26 }
  0xce   : >> { %v506_v56 = vrot.slane %v500_v50, 4 }
  0xcf   : >> { %512 = vrot.lane.b32.xlu0 %v507_v59, %s2188_s18  ;;  %v839_v59 = vpack.c.bf16 %v836_v55, %v836_v55 }
  0xd0   : >> { %370 = vrot.lane.b32.xlu1 %v362_v63, %s2192_s25  ;;  %v865_v63 = vrot.slane %v859_v60, 6 }
  0xd3   : >> { %368 = vrot.lane.b32.xlu0 %v361_v29, %s2192_s25 }
  0xd4   : >> { %441 = vrot.lane.b32.xlu1 %v436_v43, %s2190_s23 }
  0xd7   : >> { %706 = vrot.lane.b32.xlu0 %v703_v11, %s2191_s24 }
  0xd8   : >> { %783 = vrot.lane.b32.xlu1 %v778_v13, %s2189_s22 }
  0xdb   : >> { %437 = vrot.lane.b32.xlu0 %v434_v46, %s2190_s23 }
  0xdc   : >> { %508 = vrot.lane.b32.xlu1 %v505_v18, %s2188_s18 }
  0xdf   : >> { %779 = vrot.lane.b32.xlu0 %v776_v52, %s2189_s22 }
  0xe0   : >> { %708 = vrot.lane.b32.xlu1 %v704_v27, %s2191_s24 }
  0xe3   : >> { %439 = vrot.lane.b32.xlu0 %v435_v30, %s2190_s23 }
  0xe4   : >> { %655 = vrot.lane.b32.xlu1 %v650_v28, %s2194_s27 }
  0xe7   : >> { %781 = vrot.lane.b32.xlu0 %v777_v41, %s2189_s22 }
  0xe8   : >> { %651 = vrot.lane.b32.xlu1 %v648_v36, %s2194_s27 }
  0xeb   : >> { %629 = vrot.lane.b32.xlu0 %v626_v53, %s2194_s27 }
  0xec   : >> { %510 = vrot.lane.b32.xlu1 %v506_v56, %s2188_s18 }
  0xef   : >> { %846 = vrot.lane.b32.xlu0 %v839_v59, %s2187_s15 }
  0xf0   : >> { %848 = vrot.lane.b32.xlu1 %v840_v61, %s2187_s15 }
  0xf3   : >> { %868 = vrot.lane.b32.xlu0 %v864_v37, %s2187_s15 }
  0xf4   : >> { %870 = vrot.lane.b32.xlu1 %v865_v63, %s2187_s15 }
  0xf7   : >> { %844 = vrot.lane.b32.xlu0 %v838_v2, %s2187_s15 }
  0xf8   : >> { %866 = vrot.lane.b32.xlu1 %v863_v58, %s2187_s15 }
  0xfb   : >> { %1030 = vrot.lane.b32.xlu0 %v2299_v9, %s2187_s15 }
  0xfc   : >> { %1032 = vrot.lane.b32.xlu1 %v2294_v8, %s2187_s15 }
  0xff   : >> { %1339 = vrot.lane.b32.xlu0 %v2304_v10, %s2188_s18 }
 0x100   : >> { %1341 = vrot.lane.b32.xlu1 %v2313_v12, %s2188_s18 }
 0x103   : >> { %1093 = vrot.lane.b32.xlu0 %v2299_v9, %s2189_s22 }
 0x104   : >> { %1095 = vrot.lane.b32.xlu1 %v2294_v8, %s2189_s22 }
 0x107   : >> { %1401 = vrot.lane.b32.xlu0 %v2304_v10, %s2190_s23 }
 0x108   : >> { %1403 = vrot.lane.b32.xlu1 %v2313_v12, %s2190_s23 }
 0x10b   : >> { %1155 = vrot.lane.b32.xlu0 %v2299_v9, %s2191_s24 }
 0x10c   : >> { %1157 = vrot.lane.b32.xlu1 %v2294_v8, %s2191_s24 }
 0x10f   : >> { %1463 = vrot.lane.b32.xlu0 %v2304_v10, %s2192_s25 }
 0x110   : >> { %1465 = vrot.lane.b32.xlu1 %v2313_v12, %s2192_s25 }
 0x11b   : >> { %v799_v7 = vpop.permute.xlu1 %798 }
 0x121   : >> { %v803_v3 = vpop.permute.xlu0 %802 }
 0x122   : >> { %v801_v29 = vpop.permute.xlu1 %800 }
 0x123   : >> { %v804_v44 = vsel %vm408_vm13, %v799_v7, %v801_v29  ;;  %v805_v4 = vsel %vm408_vm13, %v801_v29, %v803_v3 }
 0x124   : >> { %808 = vst [vmem:[#allocation4 + $0x40] sm:$0xf] %v804_v44  ;;  %809 = vst [vmem:[#allocation4 + $0x48] sm:$0xf] %v805_v4 }
 0x125   : >> { %v733_v9 = vpop.permute.xlu0 %732 }
 0x126   : >> { %v393_v5 = vpop.permute.xlu1 %392 }
 0x129   : >> { %v535_v8 = vpop.permute.xlu0 %534 }
 0x12a   : >> { %v389_v43 = vpop.permute.xlu1 %388 }
 0x12d   : >> { %v531_v6 = vpop.permute.xlu0 %530 }
 0x12e   : >> { %v729_v10 = vpop.permute.xlu1 %728 }
 0x131   : >> { %v391_v49 = vpop.permute.xlu0 %390 }
 0x132   : >> { %v394_v12 = vsel %vm372_vm1, %v389_v43, %v391_v49  ;;  %v395_v11 = vsel %vm372_vm1, %v391_v49, %v393_v5  ;;  %v464_v42 = vpop.permute.xlu1 %463 }
 0x133   : >> { %398 = vst [vmem:[#allocation4] sm:$0x3c] %v394_v12  ;;  %399 = vst [vmem:[#allocation4 + $0x8] sm:$0x3c] %v395_v11 }
 0x135   : >> { %v462_v13 = vpop.permute.xlu0 %461 }
 0x136   : >> { %v466_v15 = vsel %vm443_vm10, %v462_v13, %v464_v42  ;;  %v460_v17 = vpop.permute.xlu1 %459 }
 0x137   : >> { %470 = vst [vmem:[#allocation4 + $0x28] sm:$0xf0] %v466_v15  ;;  %v465_v46 = vsel %vm443_vm10, %v460_v17, %v462_v13 }
 0x138   : >> { %469 = vst [vmem:[#allocation4 + $0x20] sm:$0xf0] %v465_v46 }
 0x139   : >> { %v367_v16 = vpop.permute.xlu0 %366 }
 0x13a   : >> { %v731_v39 = vpop.permute.xlu1 %730 }
 0x13b   : >> { %v734_v18 = vsel %vm479_vm0, %v729_v10, %v731_v39  ;;  %v735_v19 = vsel %vm479_vm0, %v731_v39, %v733_v9  ;;  %v2090_v39 = vld [vmem:[%s2878_s2] sm:$0xff]  }
 0x13c   : >> { %738 = vst [vmem:[#allocation4 + $0x20] ss:$-12 sps:$4 sm:$0xc3] %v734_v18   ;;  %739 = vst [vmem:[#allocation4 + $0x28] ss:$-12 sps:$4 sm:$0xc3] %v735_v19  }
 0x13d   : >> { %v711_v20 = vpop.permute.xlu0 %710  ;;  %v2091_v18 = vld [vmem:[%s2878_s2 + $0x8] sm:$0xff]   ;;  %v2611_v19 = vld [vmem:[#allocation5 + $0x10] sm:$0xff] }
 0x13e   : >> { %v533_v21 = vpop.permute.xlu1 %532 }
 0x13f   : >> { %v536_v22 = vsel %vm514_vm14, %v531_v6, %v533_v21  ;;  %v537_v48 = vsel %vm514_vm14, %v533_v21, %v535_v8 }
 0x140   : >> { %540 = vst [vmem:[#allocation4 + $0x50] ss:$-12 sps:$4 sm:$0xc3] %v536_v22   ;;  %541 = vst [vmem:[#allocation4 + $0x58] ss:$-12 sps:$4 sm:$0xc3] %v537_v48  }
 0x141   : >> { %v513_v52 = vpop.permute.xlu0 %512 }
 0x142   : >> { %v371_v23 = vpop.permute.xlu1 %370 }
 0x145   : >> { %v369_v24 = vpop.permute.xlu0 %368 }
 0x146   : >> { %v373_v27 = vsel %vm372_vm1, %v367_v16, %v369_v24  ;;  %v374_v33 = vsel %vm372_vm1, %v369_v24, %v371_v23  ;;  %v442_v28 = vpop.permute.xlu1 %441  ;;  %v2619_v23 = vld [vmem:[#allocation5 + $0x8] sm:$0xff] }
 0x147   : >> { %377 = vst [vmem:[#allocation4] sm:$0x3] %v373_v27  ;;  %378 = vst [vmem:[#allocation4 + $0x8] sm:$0x3] %v374_v33  ;;  %v2040_v33 = vpack.c.bf16 %v2611_v19, %v2611_v19 }
 0x149   : >> { %v707_v30 = vpop.permute.xlu0 %706 }
 0x14a   : >> { %v784_v31 = vpop.permute.xlu1 %783 }
 0x14d   : >> { %v438_v34 = vpop.permute.xlu0 %437 }
 0x14e   : >> { %v509_v35 = vpop.permute.xlu1 %508  ;;  %v883_v36 = vld [vmem:[#allocation4 + $0x8] sm:$0xff]  ;;  %v882_v38 = vld [vmem:[#allocation4] sm:$0xff] }
 0x14f   : >> { %913 = vmatprep.subr.bf16.mxu0 %v883_v36 }
 0x150   : >> { %914 = vmatpush1.bf16.msra.mxu0 %v882_v38 }
 0x151   : >> { %v780_v41 = vpop.permute.xlu0 %779 }
 0x152   : >> { %v709_v50 = vpop.permute.xlu1 %708 }
 0x153   : >> { %v713_v51 = vsel %vm479_vm0, %v707_v30, %v709_v50  ;;  %v714_v54 = vsel %vm479_vm0, %v709_v50, %v711_v20 }
 0x154   : >> { %717 = vst [vmem:[#allocation4 + $0x10] sm:$0x30] %v713_v51  ;;  %718 = vst [vmem:[#allocation4 + $0x18] sm:$0x30] %v714_v54 }
 0x155   : >> { %v440_v53 = vpop.permute.xlu0 %439 }
 0x156   : >> { %v444_v55 = vsel %vm443_vm10, %v438_v34, %v440_v53  ;;  %v445_v14 = vsel %vm443_vm10, %v440_v53, %v442_v28  ;;  %v656_v26 = vpop.permute.xlu1 %655 }
 0x157   : >> { %448 = vst [vmem:[#allocation4 + $0x20] sm:$0xc] %v444_v55  ;;  %449 = vst [vmem:[#allocation4 + $0x28] sm:$0xc] %v445_v14  ;;  %v658_v56 = vsel %vm635_vm15, %v2570_v25, %v656_v26 }
 0x158   : >> { %662 = vst [vmem:[#allocation4 + $0x58] sm:$0xf0] %v658_v56 }
 0x159   : >> { %v782_v47 = vpop.permute.xlu0 %781 }
 0x15a   : >> { %v786_v59 = vsel %vm408_vm13, %v780_v41, %v782_v47  ;;  %v787_v60 = vsel %vm408_vm13, %v782_v47, %v784_v31  ;;  %v652_v32 = vpop.permute.xlu1 %651 }
 0x15b   : >> { %790 = vst [vmem:[#allocation4 + $0x30] sm:$0xc0] %v786_v59  ;;  %791 = vst [vmem:[#allocation4 + $0x38] sm:$0xc0] %v787_v60  ;;  %v657_v61 = vsel %vm635_vm15, %v652_v32, %v2570_v25  ;;  %v885_v37 = vld [vmem:[#allocation4 + $0x18] sm:$0xff]  ;;  %v884_v63 = vld [vmem:[#allocation4 + $0x10] sm:$0xff] }
 0x15c   : >> { %661 = vst [vmem:[#allocation4 + $0x50] sm:$0xf0] %v657_v61  ;;  %915 = vmatprep.subr.bf16.mxu0 %v885_v37 }
 0x15d   : >> { %916 = vmatpush1.bf16.msra.mxu0 %v884_v63  ;;  %v630_v62 = vpop.permute.xlu0 %629  ;;  %v2670_v63 = vld [vmem:[#allocation5 + $0x18] sm:$0xff] }
 0x15e   : >> { %v636_v2 = vsel %vm635_vm15, %v630_v62, %v2467_v45  ;;  %v511_v58 = vpop.permute.xlu1 %510  ;;  %v887_v7 = vld [vmem:[#allocation4 + $0x28] sm:$0xff]  ;;  %v886_v25 = vld [vmem:[#allocation4 + $0x20] sm:$0xff] }
 0x15f   : >> { %640 = vst [vmem:[#allocation4 + $0x50] sm:$0xc] %v636_v2  ;;  %v515_v3 = vsel %vm514_vm14, %v509_v35, %v511_v58  ;;  %v516_v29 = vsel %vm514_vm14, %v511_v58, %v513_v52  ;;  %917 = vmatprep.subr.bf16.mxu0 %v887_v7  ;;  %v893_v11 = vld [vmem:[#allocation4 + $0x58] sm:$0xff]  ;;  %v1025_v52 = vld [vmem:[#allocation5] sm:$0xff] }
 0x160   : >> { %519 = vst [vmem:[#allocation4 + $0x40] sm:$0x30] %v515_v3  ;;  %520 = vst [vmem:[#allocation4 + $0x48] sm:$0x30] %v516_v29  ;;  %v2039_v36 = vpack.c.bf16 %v2619_v23, %v1025_v52 }
 0x161   : >> { %918 = vmatpush1.bf16.msra.mxu0 %v886_v25  ;;  %v847_v44 = vpop.permute.xlu0 %846 }
 0x162   : >> { %v849_v4 = vpop.permute.xlu1 %848  ;;  %v889_v9 = vld [vmem:[#allocation4 + $0x38] sm:$0xff]  ;;  %v888_v45 = vld [vmem:[#allocation4 + $0x30] sm:$0xff] }
 0x163   : >> { %v852_v5 = vsel %vm340_vm12, %v847_v44, %v849_v4  ;;  %919 = vmatprep.subr.bf16.mxu0 %v889_v9 }
 0x164   : >> { %856 = vst [vmem:[#allocation4 + $0x68] sm:$0x3] %v852_v5 }
 0x165   : >> { %920 = vmatpush1.bf16.msra.mxu0 %v888_v45  ;;  %v869_v8 = vpop.permute.xlu0 %868 }
 0x166   : >> { %v871_v43 = vpop.permute.xlu1 %870  ;;  %v892_v17 = vld [vmem:[#allocation4 + $0x50] sm:$0xff] }
 0x167   : >> { %v873_v6 = vsel %vm340_vm12, %v869_v8, %v871_v43  ;;  %v891_v10 = vld [vmem:[#allocation4 + $0x48] sm:$0xff]  ;;  %v890_v49 = vld [vmem:[#allocation4 + $0x40] sm:$0xff] }
 0x168   : >> { %877 = vst [vmem:[#allocation4 + $0x68] sm:$0x3c] %v873_v6  ;;  %921 = vmatprep.subr.bf16.mxu0 %v891_v10 }
 0x169   : >> { %922 = vmatpush1.bf16.msra.mxu0 %v890_v49  ;;  %v845_v12 = vpop.permute.xlu0 %844 }
 0x16a   : >> { %v851_v42 = vsel %vm340_vm12, %v845_v12, %v847_v44  ;;  %v867_v13 = vpop.permute.xlu1 %866  ;;  %923 = vmatprep.subr.bf16.mxu0 %v893_v11  ;;  %v2045_v44 = vpack.c.bf16 %v2611_v19, %v2619_v23 }
 0x16b   : >> { %855 = vst [vmem:[#allocation4 + $0x60] sm:$0x3] %v851_v42  ;;  %v872_v15 = vsel %vm340_vm12, %v867_v13, %v869_v8 }
 0x16c   : >> { %876 = vst [vmem:[#allocation4 + $0x60] sm:$0x3c] %v872_v15 }
 0x16d   : >> { %924 = vmatpush1.bf16.msra.mxu0 %v892_v17  ;;  %v2617_v22 = vpop.permute.xlu0 %1030 }
 0x16e   : >> { %v2613_v20 = vpop.permute.xlu1 %1032  ;;  %v1041_v24 = vmul.f32 %v2617_v22, %v1025_v52 }
 0x16f   : >> { %v895_v46 = vld [vmem:[#allocation4 + $0x68] sm:$0xff]  ;;  %v1043_v21 = vmul.f32 %v2613_v20, %v2611_v19 }
 0x170   : >> { %925 = vmatprep.subr.bf16.mxu0 %v895_v46 }
 0x171   : >> { %v2028_v48 = vpack.c.bf16 %v1043_v21, %v1043_v21  ;;  %v2638_v34 = vpop.permute.xlu0 %1339 }
 0x172   : >> { %v2632_v30 = vpop.permute.xlu1 %1341  ;;  %v1350_v50 = vmul.f32 %v2638_v34, %v1025_v52 }
 0x173   : >> { %v894_v16 = vld [vmem:[#allocation4 + $0x60] sm:$0xff]  ;;  %1079 = vrot.lane.b32.xlu1 %v2028_v48, %s2192_s25  ;;  %v1352_v31 = vmul.f32 %v2632_v30, %v2611_v19  ;;  %v2644_v38 = vsel %vm514_vm14, %v2638_v34, %v2632_v30 }
 0x174   : >> { %926 = vmatpush1.bf16.msra.mxu0 %v894_v16  ;;  %v1351_v51 = vmul.f32 %v2644_v38, %v2619_v23 }
 0x175   : >> { %v2050_v35 = vpack.c.bf16 %v1352_v31, %v1352_v31  ;;  %v2655_v53 = vpop.permute.xlu0 %1093 }
 0x176   : >> { %v2646_v41 = vpop.permute.xlu1 %1095  ;;  %v2049_v14 = vpack.c.bf16 %v1351_v51, %v1350_v50  ;;  %v1104_v47 = vmul.f32 %v2655_v53, %v1025_v52 }
 0x177   : >> { %1942 = vmatmul.mubr.msk.bf16.vlgmr.msra.gmra.mrb[0].mxu0 %vm635_vm15, %v2090_v39  ;;  %1251 = vrot.lane.b32.xlu1 %v2040_v33, %s2193_s26  ;;  %v1106_v54 = vmul.f32 %v2646_v41, %v2611_v19  ;;  %v2660_v26 = vsel %vm408_vm13, %v2655_v53, %v2646_v41 }
 0x178   : >> { %955 = vmatprep.mubr.bf16.mxu0 %v2195_v40  ;;  %v2624_v40 = vsel %vm340_vm12, %v2617_v22, %v2613_v20  ;;  %v1105_v59 = vmul.f32 %v2660_v26, %v2619_v23 }
 0x179   : >> { %v1042_v27 = vmul.f32 %v2624_v40, %v2619_v23  ;;  %v2032_v55 = vpack.c.bf16 %v1106_v54, %v1106_v54  ;;  %v2668_v32 = vpop.permute.xlu0 %1401 }
 0x17a   : >> { %v1404_v56 = vpop.permute.xlu1 %1403  ;;  %v2031_v37 = vpack.c.bf16 %v1105_v59, %v1104_v47  ;;  %v1412_v58 = vmul.f32 %v2668_v32, %v2619_v23 }
 0x17b   : >> { %v2027_v28 = vpack.c.bf16 %v1042_v27, %v1041_v24  ;;  %1387 = vrot.lane.b32.xlu1 %v2050_v35, %s2191_s24  ;;  %v1411_v60 = vmul.f32 %v1404_v56, %v2423_v57  ;;  %v2674_v62 = vsel %vm443_vm10, %v2668_v32, %v1404_v56  ;;  %v1414_v2 = vmul.f32 %v1404_v56, %v2670_v63 }
 0x17c   : >> { %v1413_v57 = vmul.f32 %v2674_v62, %v2611_v19 }
 0x17d   : >> { %1077 = vrot.lane.b32.xlu0 %v2027_v28, %s2192_s25  ;;  %v2052_v61 = vpack.c.bf16 %v1411_v60, %v1411_v60  ;;  %v2054_v7 = vpack.c.bf16 %v1414_v2, %v1414_v2  ;;  %v2693_v45 = vpop.permute.xlu0 %1155 }
 0x17e   : >> { %v2053_v3 = vpack.c.bf16 %v1413_v57, %v1412_v58  ;;  %v2685_v29 = vpop.permute.xlu1 %1157 }
 0x17f   : >> { %1943 = vmatmul.mubr.msk.bf16.gmra.mrb[4].mxu0 %vm635_vm15, %v2091_v18  ;;  %1141 = vrot.lane.b32.xlu1 %v2032_v55, %s2190_s23  ;;  %v2689_v25 = vmul.f32 %v2670_v63, %v2685_v29 }
 0x180   : > { %1853 = vmatprep.mubr.f32.mxu0 (%p320_p4), %v2186_v1 }
 0x181   : >> { %1249 = vrot.lane.b32.xlu0 %v2039_v36, %s2193_s26  ;;  %v2697_v11 = vpop.permute.xlu0 %1463 }
 0x182   : >> { %v2695_v12 = vpop.permute.xlu1 %1465 }
 0x183   : >> { %1428 = vrot.lane.b32.xlu1 %v2052_v61, %s2189_s22 }
 0x185   : >> { %1385 = vrot.lane.b32.xlu0 %v2049_v14, %s2191_s24 }
 0x187   : >> { %1449 = vrot.lane.b32.xlu1 %v2054_v7, %s2189_s22 }
 0x189   : >> { %1139 = vrot.lane.b32.xlu0 %v2031_v37, %s2190_s23 }
 0x18d   : >> { %1447 = vrot.lane.b32.xlu0 %v2053_v3, %s2189_s22 }
 0x1e5   : >> { %v1080_v13 = vpop.permute.xlu1 %1079 }
 0x1e6   : >> { %v1082_v18 = vrot.slane %v1080_v13, 4 }
 0x1e9   : >> { %v1252_v21 = vpop.permute.xlu1 %1251 }
 0x1ea   : >> { %v1254_v35 = vrot.slane %v1252_v21, 4 }
 0x1ed   : >> { %v1388_v55 = vpop.permute.xlu1 %1387 }
 0x1ee   : >> { %v1390_v59 = vrot.slane %v1388_v55, 4 }
 0x1ef   : >> { %v1078_v48 = vpop.permute.xlu0 %1077 }
 0x1f0   : >> { %v1081_v24 = vrot.slane %v1078_v48, 4 }
 0x1f1   : >> { %v1142_v37 = vpop.permute.xlu1 %1141 }
 0x1f2   : >> { %v1083_v36 = vsel %vm1061_vm2, %v1081_v24, %v1082_v18  ;;  %v1144_v3 = vrot.slane %v1142_v37, 4  ;;  %v1087_v37 = vld [vmem:[#allocation2] sm:$0xff] }
 0x1f3   : >> { %v2701_v54 = vsel %vm372_vm1, %v1078_v48, %v1083_v36  ;;  %v1250_v14 = vpop.permute.xlu0 %1249 }
 0x1f4   : >> { %v1253_v47 = vrot.slane %v1250_v14, 4 }
 0x1f6   : >> { %v1255_v60 = vsel %vm1061_vm2, %v1253_v47, %v1254_v35 }
 0x1f7   : >> { %v2705_v61 = vsel %vm567_vm11, %v1250_v14, %v1255_v60  ;;  %v1386_v2 = vpop.permute.xlu0 %1385 }
 0x1f8   : >> { %v1389_v58 = vrot.slane %v1386_v2, 4 }
 0x24a   : >> { %v947_v4 = vpop.f32.mrb[0].mxu0 }
 0x24b   : >> { %v1944_v9 = vmul.f32 -1.442695, %v947_v4  ;;  %v949_v5 = vpop.f32.mrb[1].mxu0  ;;  %v1391_v4 = vsel %vm1061_vm2, %v1389_v58, %v1390_v59  ;;  %v1159_v58 = vsel %vm479_vm0, %v2693_v45, %v2685_v29 }
 0x24c   : >> { %v1945_v8 = vmul.f32 -1.442695, %v949_v5  ;;  %v951_v43 = vpop.f32.mrb[2].mxu0  ;;  %v2709_v5 = vsel %vm479_vm0, %v1386_v2, %v1391_v4 }
 0x24d   : >> { %2100 = vpow2.f32 %v1944_v9  ;;  %v1946_v6 = vmul.f32 -1.442695, %v951_v43  ;;  %v953_v10 = vpop.f32.mrb[3].mxu0  ;;  %v1140_v43 = vpop.permute.xlu0 %1139 }
 0x24e   : >> { %2102 = vpow2.f32 %v1945_v8  ;;  %v1947_v49 = vmul.f32 -1.442695, %v953_v10  ;;  %v2711_v8 = vpop.permute.xlu1 %1428  ;;  %v1143_v10 = vrot.slane %v1140_v43, 4 }
 0x24f   : >> { %2104 = vpow2.f32 %v1946_v6 }
 0x250   : >> { %2106 = vpow2.f32 %v1947_v49 }
 0x251   : >> { %v1448_v24 = vpop.permute.xlu0 %1447 }
 0x252   : >> { %v957_v42 = vpop.f32.mrb[4].mxu0 }
 0x253   : >> { %v1948_v15 = vmul.f32 -1.442695, %v957_v42  ;;  %v959_v17 = vpop.f32.mrb[5].mxu0  ;;  %v1004_v42 = vld [vmem:[#allocation3] sm:$0xff] }
 0x254   : >> { %v1949_v46 = vmul.f32 -1.442695, %v959_v17  ;;  %v961_v16 = vpop.f32.mrb[6].mxu0 }
 0x255   : >> { %v963_v39 = vpop.f32.mrb[7].mxu0  ;;  %2108 = vpow2.f32 %v1948_v15 }
 0x256   : >> { %2110 = vpow2.f32 %v1949_v46  ;;  %v1005_v46 = vld [vmem:[#allocation3 + $0x8] sm:$0xff] }
 0x257   : >> { %v2101_v52 = vpop.eup %2100  ;;  %2112 = vtanh.f32 %v961_v16  ;;  %v1145_v16 = vsel %vm1061_vm2, %v1143_v10, %v1144_v3  ;;  %v1101_v10 = vmul.f32 %v2655_v53, %v1087_v37 }
 0x258   : >> { %v2103_v27 = vpop.eup %2102  ;;  %v972_v33 = vadd.f32 1.0, %v2101_v52  ;;  %2114 = vtanh.f32 %v963_v39  ;;  %v2715_v48 = vsel %vm443_vm10, %v1140_v43, %v1145_v16  ;;  %v1450_v52 = vpop.permute.xlu1 %1449 }
 0x259   : >> { %v2105_v28 = vpop.eup %2104  ;;  %v973_v31 = vadd.f32 1.0, %v2103_v27 }
 0x25a   : >> { %v2107_v50 = vpop.eup %2106  ;;  %2116 = vrcp.f32 %v972_v33  ;;  %v984_v51 = vadd.f32 1.0, %v2105_v28  ;;  %v1452_v28 = vrot.slane %v1450_v52, 4 }
 0x25b   : >> { %2118 = vrcp.f32 %v973_v31  ;;  %v985_v56 = vadd.f32 1.0, %v2107_v50  ;;  %v1451_v31 = vrot.slane %v1448_v24, 4 }
 0x25c   : >> { %2120 = vrcp.f32 %v984_v51 }
 0x25d   : >> { %2122 = vrcp.f32 %v985_v56  ;;  %v1453_v50 = vsel %vm1061_vm2, %v1451_v31, %v1452_v28 }
 0x25e   : >> { %v2719_v55 = vsel %vm408_vm13, %v1448_v24, %v1453_v50  ;;  %v2046_v50 = vpack.c.bf16 %v2670_v63, %v2670_v63 }
 0x25f   : >> { %v2109_v57 = vpop.eup %2108 }
 0x260   : >> { %v2111_v7 = vpop.eup %2110  ;;  %v996_v15 = vadd.f32 1.0, %v2109_v57  ;;  %v2731_v57 = vsel %vm372_vm1, %v2697_v11, %v2695_v12 }
 0x261   : >> { %v2113_v9 = vpop.eup %2112  ;;  %v997_v18 = vadd.f32 1.0, %v2111_v7  ;;  %v2164_v7 = vld [vmem:[#allocation2] sm:$0xff] }
 0x262   : >> { %v2115_v6 = vpop.eup %2114  ;;  %2124 = vrcp.f32 %v996_v15  ;;  %v1038_v3 = vmul.f32 %v2164_v7, %v2617_v22 }
 0x263   : >> { %2126 = vrcp.f32 %v997_v18 }
 0x264   : >> { %v2117_v49 = vpop.eup %2116 }
 0x265   : >> { %v2119_v13 = vpop.eup %2118  ;;  %v1008_v17 = vmul.f32 %v2117_v49, %v2113_v9  ;;  %v1347_v9 = vmul.f32 %v2164_v7, %v2638_v34 }
 0x266   : >> { %v2121_v39 = vpop.eup %2120  ;;  %v1009_v21 = vmul.f32 %v2119_v13, %v2115_v6 }
 0x267   : >> { %v2123_v27 = vpop.eup %2122  ;;  %v1006_v33 = vmul.f32 %v2121_v39, %v1004_v42 }
 0x268   : >> { %v1007_v35 = vmul.f32 %v2123_v27, %v1005_v46  ;;  %v2165_v46 = vld [vmem:[#allocation2 + $0x18] sm:$0xff]  ;;  %v1166_v27 = vmul.f32 %v2693_v45, %v2619_v23 }
 0x269   : >> { %v1010_v36 = vadd.f32 %v1008_v17, %v1006_v33  ;;  %v1165_v16 = vmul.f32 %v2165_v46, %v2685_v29  ;;  %v1167_v33 = vmul.f32 %v1159_v58, %v2611_v19 }
 0x26a   : >> { %v1011_v51 = vadd.f32 %v1009_v21, %v1007_v35 }
 0x26b   : >> { %2128 = vtanh.f32 %v1010_v36  ;;  %1016 = vst [vmem:[#allocation3] sm:$0xff] %v1010_v36  ;;  %v2034_v52 = vpack.c.bf16 %v1165_v16, %v1165_v16  ;;  %v2035_v35 = vpack.c.bf16 %v1167_v33, %v1166_v27  ;;  %v1473_v36 = vmul.f32 %v2165_v46, %v2695_v12 }
 0x26c   : >> { %2130 = vtanh.f32 %v1011_v51  ;;  %1017 = vst [vmem:[#allocation3 + $0x8] sm:$0xff] %v1011_v51  ;;  %v2125_v14 = vpop.eup %2124 }
 0x26d   : >> { %v2127_v56 = vpop.eup %2126  ;;  %v2056_v51 = vpack.c.bf16 %v1473_v36, %v1473_v36 }
 0x275   : >> { %v2129_v47 = vpop.eup %2128 }
 0x276   : >> { %v2131_v59 = vpop.eup %2130  ;;  %v2721_v60 = vmul.f32 %v2129_v47, %v2125_v14 }
 0x277   : >> { %v2723_v2 = vmul.f32 %v2131_v59, %v2127_v56  ;;  %v1475_v56 = vmul.f32 %v2731_v57, %v2611_v19 }
 0x278   : >> { %1018 = vst [vmem:[#allocation2 + $0x8] sm:$0xff] %v2721_v60  ;;  %v1039_v4 = vmul.f32 %v2624_v40, %v2721_v60  ;;  %v1409_v43 = vmul.f32 %v2668_v32, %v2721_v60  ;;  %v1348_v6 = vmul.f32 %v2644_v38, %v2721_v60  ;;  %v1102_v49 = vmul.f32 %v2660_v26, %v2721_v60 }
 0x279   : >> { %1019 = vst [vmem:[#allocation2 + $0x10] sm:$0xff] %v2723_v2  ;;  %v1410_v22 = vmul.f32 %v2674_v62, %v2723_v2  ;;  %v1163_v40 = vmul.f32 %v2693_v45, %v2721_v60  ;;  %v1164_v34 = vmul.f32 %v1159_v58, %v2723_v2  ;;  %v1471_v32 = vmul.f32 %v2697_v11, %v2721_v60 }
 0x27a   : >> { %v1472_v42 = vmul.f32 %v2731_v57, %v2723_v2  ;;  %v1040_v38 = vmul.f32 %v2613_v20, %v2723_v2  ;;  %v2037_v26 = vpack.c.bf16 %v2721_v60, %v1087_v37  ;;  %v2038_v62 = vpack.c.bf16 %v2723_v2, %v2723_v2 }
 0x27b   : >> { %v2051_v53 = vpack.c.bf16 %v1410_v22, %v1409_v43  ;;  %v2033_v13 = vpack.c.bf16 %v1164_v34, %v1163_v40  ;;  %v2025_v17 = vpack.c.bf16 %v1039_v4, %v1038_v3  ;;  %v2047_v39 = vpack.c.bf16 %v1348_v6, %v1347_v9 }
 0x27c   : >> { %v2055_v15 = vpack.c.bf16 %v1472_v42, %v1471_v32  ;;  %1228 = vrot.lane.b32.xlu0 %v2037_v26, %s2193_s26  ;;  %1230 = vrot.lane.b32.xlu1 %v2038_v62, %s2193_s26  ;;  %v2029_v18 = vpack.c.bf16 %v1102_v49, %v1101_v10  ;;  %v2043_v20 = vpack.c.bf16 %v2723_v2, %v2721_v60 }
 0x27d   : >> { %v2026_v21 = vpack.c.bf16 %v1040_v38, %v1040_v38  ;;  %v1349_v24 = vmul.f32 %v2632_v30, %v2723_v2  ;;  %v1103_v29 = vmul.f32 %v2646_v41, %v2723_v2  ;;  %v1283_v30 = vld [vmem:[#allocation2 + $0x18] sm:$0xff]  ;;  %v2036_v41 = vpack.c.bf16 %v2689_v25, %v2689_v25 }
 0x27e   : >> { %v2044_v45 = vpack.c.bf16 %v1283_v30, %v1283_v30  ;;  %v1476_v25 = vmul.f32 %v2695_v12, %v2670_v63  ;;  %v2096_v63 = vld [vmem:[%s2879_s3 + $0x4] ss:$8 sps:$4 sm:$0xff]  }
 0x27f   : >> { %v2048_v28 = vpack.c.bf16 %v1349_v24, %v1349_v24  ;;  %v2030_v31 = vpack.c.bf16 %v1103_v29, %v1103_v29  ;;  %2011 = vmatprep.mubr.msk.bf16.mxu1 %vm1655_vm3, %v2096_v63 }
 0x280   : >> { %1055 = vrot.lane.b32.xlu0 %v2025_v17, %s2192_s25  ;;  %1057 = vrot.lane.b32.xlu1 %v2026_v21, %s2192_s25  ;;  %v2058_v14 = vpack.c.bf16 %v1476_v25, %v1476_v25 }
 0x284   : >> { %1364 = vrot.lane.b32.xlu0 %v2047_v39, %s2191_s24  ;;  %1182 = vrot.lane.b32.xlu1 %v2034_v52, %s2188_s18 }
 0x288   : >> { %1118 = vrot.lane.b32.xlu0 %v2029_v18, %s2190_s23  ;;  %1366 = vrot.lane.b32.xlu1 %v2048_v28, %s2191_s24 }
 0x28c   : >> { %1201 = vrot.lane.b32.xlu0 %v2035_v35, %s2188_s18  ;;  %1120 = vrot.lane.b32.xlu1 %v2030_v31, %s2190_s23 }
 0x290   : >> { %1298 = vrot.lane.b32.xlu0 %v2043_v20, %s2194_s27  ;;  %1203 = vrot.lane.b32.xlu1 %v2036_v41, %s2188_s18 }
 0x294   : >> { %1319 = vrot.lane.b32.xlu0 %v2045_v44, %s2194_s27  ;;  %1300 = vrot.lane.b32.xlu1 %v2044_v45, %s2194_s27  ;;  %v1474_v44 = vmul.f32 %v2697_v11, %v2619_v23  ;;  %v2168_v45 = vpack.c.bf16 %v2619_v23, %v2721_v60 }
 0x296   : >> { %v2057_v47 = vpack.c.bf16 %v1475_v56, %v1474_v44 }
 0x298   : >> { %1426 = vrot.lane.b32.xlu0 %v2051_v53, %s2189_s22  ;;  %1321 = vrot.lane.b32.xlu1 %v2046_v50, %s2194_s27 }
 0x29c   : >> { %1180 = vrot.lane.b32.xlu0 %v2033_v13, %s2188_s18  ;;  %1490 = vrot.lane.b32.xlu1 %v2056_v51, %s2187_s15 }
 0x2a0   : >> { %1488 = vrot.lane.b32.xlu0 %v2055_v15, %s2187_s15  ;;  %1511 = vrot.lane.b32.xlu1 %v2058_v14, %s2187_s15 }
 0x2a4   : >> { %1509 = vrot.lane.b32.xlu0 %v2057_v47, %s2187_s15 }
 0x2ee   : >> { %v1229_v12 = vpop.permute.xlu0 %1228  ;;  %v1231_v59 = vpop.permute.xlu1 %1230 }
 0x2ef   : >> { %v1232_v11 = vrot.slane %v1229_v12, 4  ;;  %v1233_v37 = vrot.slane %v1231_v59, 4 }
 0x2f1   : >> { %v1234_v58 = vsel %vm1061_vm2, %v1232_v11, %v1233_v37 }
 0x2f2   : >> { %v1235_v57 = vsel %vm567_vm11, %v1229_v12, %v1234_v58  ;;  %v1056_v7 = vpop.permute.xlu0 %1055  ;;  %v1058_v3 = vpop.permute.xlu1 %1057 }
 0x2f3   : >> { %v1059_v4 = vrot.slane %v1056_v7, 4  ;;  %v1060_v9 = vrot.slane %v1058_v3, 4  ;;  %v1993_v34 = vcombine.high %v1235_v57, %v2705_v61  ;;  %v1992_v26 = vcombine.low %v1235_v57, %v2705_v61 }
 0x2f5   : >> { %v1062_v43 = vsel %vm1061_vm2, %v1059_v4, %v1060_v9 }
 0x2f6   : >> { %v1063_v6 = vsel %vm372_vm1, %v1056_v7, %v1062_v43  ;;  %v1365_v10 = vpop.permute.xlu0 %1364  ;;  %v2813_v49 = vpop.permute.xlu1 %1182 }
 0x2f7   : >> { %v1991_v22 = vcombine.high %v1063_v6, %v2701_v54  ;;  %v1990_v40 = vcombine.low %v1063_v6, %v2701_v54  ;;  %v1368_v38 = vrot.slane %v1365_v10, 4  ;;  %v1185_v12 = vrot.slane %v2813_v49, 4 }
 0x2f9   : >> { %1669 = vmatprep.subr.bf16.mxu1 %v1991_v22 }
 0x2fa   : >> { %v1119_v32 = vpop.permute.xlu0 %1118  ;;  %v1367_v42 = vpop.permute.xlu1 %1366  ;;  %1670 = vmatpush1.bf16.msra.mxu1 %v1990_v40 }
 0x2fb   : >> { %v1369_v53 = vrot.slane %v1367_v42, 4  ;;  %1671 = vmatprep.subr.bf16.mxu1 %v1993_v34  ;;  %v1122_v46 = vrot.slane %v1119_v32, 4 }
 0x2fd   : >> { %v1370_v62 = vsel %vm1061_vm2, %v1368_v38, %v1369_v53 }
 0x2fe   : >> { %v1371_v13 = vsel %vm479_vm0, %v1365_v10, %v1370_v62  ;;  %v1202_v15 = vpop.permute.xlu0 %1201  ;;  %v1121_v17 = vpop.permute.xlu1 %1120  ;;  %1672 = vmatpush1.bf16.msra.mxu1 %v1992_v26 }
 0x2ff   : >> { %v1123_v54 = vrot.slane %v1121_v17, 4  ;;  %v1995_v16 = vcombine.high %v1371_v13, %v2709_v5  ;;  %v1994_v39 = vcombine.low %v1371_v13, %v2709_v5  ;;  %v1205_v52 = vrot.slane %v1202_v15, 4  ;;  %v2094_v17 = vld [vmem:[%s2879_s3] ss:$8 sps:$4 sm:$0xff]  }
 0x300   : >> { %v2167_v5 = vpack.c.bf16 %v2611_v19, %v2723_v2  ;;  %v1431_v19 = vrot.slane %v2711_v8, 4 }
 0x301   : >> { %v1124_v18 = vsel %vm1061_vm2, %v1122_v46, %v1123_v54  ;;  %1673 = vmatprep.subr.bf16.mxu1 %v1995_v16  ;;  %v2097_v46 = vld [vmem:[%s2879_s3 + $0x14] ss:$8 sps:$4 sm:$0xff]   ;;  %v2099_v54 = vld [vmem:[%s2879_s3 + $0x10] ss:$8 sps:$4 sm:$0xff]  }
 0x302   : >> { %v1125_v20 = vsel %vm443_vm10, %v1119_v32, %v1124_v18  ;;  %v1299_v21 = vpop.permute.xlu0 %1298  ;;  %v1204_v61 = vpop.permute.xlu1 %1203  ;;  %1674 = vmatpush1.bf16.msra.mxu1 %v1994_v39  ;;  %v1541_v32 = vld [vmem:[#allocation7 + $0x90] sm:$0xff] }
 0x303   : >> { %v1206_v24 = vrot.slane %v1204_v61, 4  ;;  %v1997_v29 = vcombine.high %v1125_v20, %v2715_v48  ;;  %v1996_v27 = vcombine.low %v1125_v20, %v2715_v48  ;;  %v1302_v30 = vrot.slane %v1299_v21, 4 }
 0x304   : >> { %v2009_v62 = vcombine.high %v1541_v32, %v1541_v32  ;;  %v2008_v13 = vcombine.low %v1541_v32, %v1541_v32 }
 0x305   : >> { %v1207_v33 = vsel %vm1061_vm2, %v1205_v52, %v1206_v24  ;;  %1675 = vmatprep.subr.bf16.mxu1 %v1997_v29 }
 0x306   : >> { %v1208_v28 = vsel %vm514_vm14, %v1202_v15, %v1207_v33  ;;  %v1320_v31 = vpop.permute.xlu0 %1319  ;;  %v1301_v35 = vpop.permute.xlu1 %1300  ;;  %1676 = vmatpush1.bf16.msra.mxu1 %v1996_v27  ;;  %v1664_v15 = vsel %vm1061_vm2, %v2008_v13, 0 }
 0x307   : >> { %v1303_v41 = vrot.slane %v1301_v35, 4  ;;  %1677 = vmatprep.subr.bf16.mxu1 %v2167_v5  ;;  %v1323_v2 = vrot.slane %v1320_v31, 4 }
 0x309   : >> { %v1304_v36 = vsel %vm1061_vm2, %v1302_v30, %v1303_v41 }
 0x30a   : >> { %v1305_v48 = vsel %vm635_vm15, %v1299_v21, %v1304_v36  ;;  %v1427_v50 = vpop.permute.xlu0 %1426  ;;  %v1322_v51 = vpop.permute.xlu1 %1321  ;;  %1678 = vmatpush1.bf16.msra.mxu1 %v2168_v45 }
 0x30b   : >> { %v1430_v25 = vrot.slane %v1427_v50, 4  ;;  %v1324_v14 = vrot.slane %v1322_v51, 4 }
 0x30d   : >> { %v1432_v44 = vsel %vm1061_vm2, %v1430_v25, %v1431_v19  ;;  %v1325_v56 = vsel %vm1061_vm2, %v1323_v2, %v1324_v14 }
 0x30e   : >> { %v1433_v47 = vsel %vm408_vm13, %v1427_v50, %v1432_v44  ;;  %v1326_v23 = vsel %vm635_vm15, %v1320_v31, %v1325_v56  ;;  %v1181_v60 = vpop.permute.xlu0 %1180  ;;  %v1491_v63 = vpop.permute.xlu1 %1490  ;;  %v1760_v56 = vld [vmem:[#allocation6] sm:$0xff] }
 0x30f   : >> { %v1184_v59 = vrot.slane %v1181_v60, 4  ;;  %v2001_v11 = vcombine.high %v1433_v47, %v2719_v55  ;;  %v2000_v8 = vcombine.low %v1433_v47, %v2719_v55  ;;  %v1493_v58 = vrot.slane %v1491_v63, 4  ;;  %v1761_v63 = vld [vmem:[#allocation6 + $0x8] sm:$0xff] }
 0x310   : >> { %v2005_v10 = vcombine.high %v1305_v48, %v1326_v23  ;;  %v2004_v34 = vcombine.low %v1305_v48, %v1326_v23 }
 0x311   : >> { %v1186_v37 = vsel %vm1061_vm2, %v1184_v59, %v1185_v12  ;;  %1679 = vmatprep.subr.bf16.mxu1 %v2001_v11 }
 0x312   : >> { %v1187_v57 = vsel %vm514_vm14, %v1181_v60, %v1186_v37  ;;  %v1489_v7 = vpop.permute.xlu0 %1488  ;;  %1680 = vmatpush1.bf16.msra.mxu1 %v2000_v8  ;;  %v1512_v43 = vpop.permute.xlu1 %1511 }
 0x313   : >> { %v1492_v3 = vrot.slane %v1489_v7, 4  ;;  %v2003_v4 = vcombine.high %v1187_v57, %v1208_v28  ;;  %v2002_v9 = vcombine.low %v1187_v57, %v1208_v28  ;;  %v1514_v55 = vrot.slane %v1512_v43, 4 }
 0x315   : >> { %v1494_v6 = vsel %vm1061_vm2, %v1492_v3, %v1493_v58  ;;  %1681 = vmatprep.subr.bf16.mxu1 %v2003_v4 }
 0x316   : >> { %v1495_v49 = vsel %vm340_vm12, %v1489_v7, %v1494_v6  ;;  %v1510_v22 = vpop.permute.xlu0 %1509  ;;  %1682 = vmatpush1.bf16.msra.mxu1 %v2002_v9 }
 0x317   : >> { %v1513_v40 = vrot.slane %v1510_v22, 4  ;;  %1683 = vmatprep.subr.bf16.mxu1 %v2005_v10 }
 0x319   : >> { %v1515_v42 = vsel %vm1061_vm2, %v1513_v40, %v1514_v55  ;;  %v1778_v55 = vld [vmem:[%s2880_s4] sm:$0x7] (%p320_p4) }
 0x31a   : >> { %v1516_v38 = vsel %vm340_vm12, %v1510_v22, %v1515_v42  ;;  %1684 = vmatpush1.bf16.msra.mxu1 %v2004_v34  ;;  %v1779_v40 = vld [vmem:[%s2881_s5] sm:$0x7] (%p320_p4) }
 0x31b   : >> { %v2007_v53 = vcombine.high %v1495_v49, %v1516_v38  ;;  %v2006_v26 = vcombine.low %v1495_v49, %v1516_v38  ;;  %1782 = vperm.xlu0 (%p320_p4), %2166, %v1779_v40  }
 0x31d   : >> { %1685 = vmatprep.subr.bf16.mxu1 %v2007_v53 }
 0x31e   : >> { %1686 = vmatpush1.bf16.msra.mxu1 %v2006_v26 }
 0x31f   : >> { %2010 = vmatprep.subr.msk.bf16.mxu1 %vm1061_vm2, %v2009_v62 }
 0x322   : >> { %1688 = vmatpush1.bf16.msra.mxu1 %v1664_v15 }
 0x325   : >> { %1702 = vmatmul.mubr.bf16.vlgmr.msra.gmra.mrb[0].mxu1 %v2094_v17 }
 0x326   : >> { %2012 = vmatprep.mubr.msk.bf16.mxu1 %vm1655_vm3, %v2097_v46 }
 0x32d   : >> { %1712 = vmatmul.mubr.bf16.gmra.mrb[4].mxu1 %v2099_v54 }
 0x39a   : > { %v1783_v34 = vpop.permute.xlu0 (%p320_p4), %1782 }
 0x3f8   : >> { %v1703_v16 = vpop.f32.mrb[0].mxu1 }
 0x3f9   : >> { %v2013_v39 = vmul.f32 -1.442695, %v1703_v16  ;;  %v1705_v18 = vpop.f32.mrb[1].mxu1 }
 0x3fa   : >> { %v2014_v20 = vmul.f32 -1.442695, %v1705_v18  ;;  %v1707_v21 = vpop.f32.mrb[2].mxu1 }
 0x3fb   : >> { %2132 = vpow2.f32 %v2013_v39  ;;  %v2015_v61 = vmul.f32 -1.442695, %v1707_v21  ;;  %v1709_v52 = vpop.f32.mrb[3].mxu1 }
 0x3fc   : >> { %2134 = vpow2.f32 %v2014_v20  ;;  %v2016_v24 = vmul.f32 -1.442695, %v1709_v52 }
 0x3fd   : >> { %2136 = vpow2.f32 %v2015_v61 }
 0x3fe   : >> { %2138 = vpow2.f32 %v2016_v24 }
 0x400   : >> { %v1713_v29 = vpop.f32.mrb[4].mxu1 }
 0x401   : >> { %v2017_v27 = vmul.f32 -1.442695, %v1713_v29  ;;  %v1715_v33 = vpop.f32.mrb[5].mxu1 }
 0x402   : >> { %v2018_v5 = vmul.f32 -1.442695, %v1715_v33  ;;  %v1717_v28 = vpop.f32.mrb[6].mxu1 }
 0x403   : >> { %v1719_v31 = vpop.f32.mrb[7].mxu1  ;;  %2140 = vpow2.f32 %v2017_v27 }
 0x404   : >> { %2142 = vpow2.f32 %v2018_v5 }
 0x405   : >> { %v2133_v35 = vpop.eup %2132  ;;  %2144 = vtanh.f32 %v1717_v28 }
 0x406   : >> { %v2135_v30 = vpop.eup %2134  ;;  %v1728_v41 = vadd.f32 1.0, %v2133_v35  ;;  %2146 = vtanh.f32 %v1719_v31 }
 0x407   : >> { %v2137_v45 = vpop.eup %2136  ;;  %v1729_v36 = vadd.f32 1.0, %v2135_v30 }
 0x408   : >> { %v2139_v48 = vpop.eup %2138  ;;  %2148 = vrcp.f32 %v1728_v41  ;;  %v1740_v50 = vadd.f32 1.0, %v2137_v45 }
 0x409   : >> { %2150 = vrcp.f32 %v1729_v36  ;;  %v1741_v51 = vadd.f32 1.0, %v2139_v48 }
 0x40a   : >> { %2152 = vrcp.f32 %v1740_v50 }
 0x40b   : >> { %2154 = vrcp.f32 %v1741_v51 }
 0x40d   : >> { %v2141_v19 = vpop.eup %2140 }
 0x40e   : >> { %v2143_v2 = vpop.eup %2142  ;;  %v1752_v23 = vadd.f32 1.0, %v2141_v19 }
 0x40f   : >> { %v2145_v25 = vpop.eup %2144  ;;  %v1753_v59 = vadd.f32 1.0, %v2143_v2 }
 0x410   : >> { %v2147_v14 = vpop.eup %2146  ;;  %2156 = vrcp.f32 %v1752_v23 }
 0x411   : >> { %2158 = vrcp.f32 %v1753_v59 }
 0x412   : >> { %v2149_v44 = vpop.eup %2148 }
 0x413   : >> { %v2151_v47 = vpop.eup %2150  ;;  %v1764_v60 = vmul.f32 %v2149_v44, %v2145_v25 }
 0x414   : >> { %v2153_v12 = vpop.eup %2152  ;;  %v1765_v11 = vmul.f32 %v2151_v47, %v2147_v14 }
 0x415   : >> { %v2155_v8 = vpop.eup %2154  ;;  %v1762_v37 = vmul.f32 %v2153_v12, %v1760_v56 }
 0x416   : >> { %v1763_v58 = vmul.f32 %v2155_v8, %v1761_v63 }
 0x417   : >> { %v1766_v57 = vadd.f32 %v1764_v60, %v1762_v37 }
 0x418   : >> { %v1767_v7 = vadd.f32 %v1765_v11, %v1763_v58 }
 0x419   : >> { %2160 = vtanh.f32 %v1766_v57  ;;  %1772 = vst [vmem:[#allocation6] sm:$0xff] %v1766_v57 }
 0x41a   : >> { %2162 = vtanh.f32 %v1767_v7  ;;  %1773 = vst [vmem:[#allocation6 + $0x8] sm:$0xff] %v1767_v7  ;;  %v2157_v3 = vpop.eup %2156 }
 0x41b   : >> { %v2159_v4 = vpop.eup %2158 }
 0x421   : > { %322 = sbr.rel (!%p320_p4) target bundleno = 25 (0x19), region = 83 }
 0x423   : >> { %v2161_v9 = vpop.eup %2160 }
 0x424   : >> { %v2163_v43 = vpop.eup %2162  ;;  %v1770_v6 = vmul.f32 %v2161_v9, %v2157_v3 }
 0x425   : >> { %v1771_v10 = vmul.f32 %v2163_v43, %v2159_v4 }
 0x426   : >> { %1774 = vst [vmem:[#allocation5 + $0x8] sm:$0xff] %v1770_v6 }
 0x427   : >> { %1775 = vst [vmem:[#allocation5 + $0x10] sm:$0xff] %v1771_v10 }
 0x42d   : > { %v1776_v22 = vld [vmem:[#allocation5 + $0x8] sm:$0xff] }
 0x42e   : > { %v1777_v49 = vld [vmem:[#allocation5 + $0x10] sm:$0xff] }
 0x42f   : > { %1789 = vmatprep.subr.mxu0 %v1777_v49 }
 0x430   : > { %1790 = vmatpush1.msra.mxu0 %v1776_v22 }
 0x431   : > { %2019 = vmatmul.mubr.msk.f32.vlgmr.msra.gmra.mrb[0].mxu0 %vm1785_vm4, %v1778_v55 }
 0x504   : > { %v1855_v32 = vpop.f32.mrb[0].mxu0 }
 0x505   : > { %v1856_v42 = vadd.f32 %v1855_v32, %v1783_v34  ;;  %v1857_v38 = vpop.f32.mrb[1].mxu0 }
 0x506   : > { %v1858_v1 = vadd.f32 %v1857_v38, %v1783_v34 }
 0x508   : > { %v1862_v53 = vcombine.low %v1856_v42, %v1858_v1 }
 0x50a   : > { %1864 = vst [vmem:[%s2284_s7] sm:$0x77] %v1862_v53 }
 0x50b PF: > { %s16_s21 = sadd.s32 1, %s2179_s21  }
 0x50c   : > { %p13_p5 = scmp.ge.s32.totalorder %s16_s21, 4  }
 0x50e   :  { %15 = sbr.rel (!%p13_p5) target bundleno = 1 (0x1), region = 94 }

</bundles_post_ra>
